<compile_context>
chip_gen: v7x
topology: tpu7x:2x2x1
jax: 0.10.0
libtpu: 0.0.40
codegen_flags: <defaults>
</compile_context>

<pallas_src>
import jax
import jax.numpy as jnp
from jax.experimental import pallas as pl
from jax.experimental.pallas import tpu as pltpu

_LN_EPS = 1e-5
_INV_SQRT2 = 0.7071067811865476


def _gelu_exact(x):
    # PyTorch nn.GELU() default: exact erf formulation (kept in f32).
    return 0.5 * x * (1.0 + jax.lax.erf(x * jnp.float32(_INV_SQRT2)))


def _layernorm(x, w, b):
    # x: (M, C); w, b: (1, C); normalize over the channel axis.
    mu = jnp.mean(x, axis=-1, keepdims=True)
    var = jnp.mean((x - mu) ** 2, axis=-1, keepdims=True)
    return (x - mu) * jax.lax.rsqrt(var + _LN_EPS) * w + b


def _make_kernel(Bb, T):
    def kernel(x_ref,        # (Bb*T, C) f32
               ln1_w_ref, ln1_b_ref,        # (1, C) f32
               tw1_ref, tb1_ref,            # (Dt, T) bf16, (Dt, 1) f32
               tw2_ref, tb2_ref,            # (T, Dt) bf16, (T, 1) f32
               ln2_w_ref, ln2_b_ref,        # (1, C) f32
               cw1_ref, cb1_ref,            # (C, Dc) bf16, (1, Dc) f32
               cw2_ref, cb2_ref,            # (Dc, C) bf16, (1, C) f32
               o_ref,                       # (Bb*T, C)
               x1_scr):                     # (Bb*T, C) f32 scratch
        x = x_ref[...]                                      # f32

        # ---- token mixer: LN over C, dense mix over T (Conv1d k=1) ----
        h = _layernorm(x, ln1_w_ref[...], ln1_b_ref[...])   # (Bb*T, C) f32
        tw1 = tw1_ref[...]
        tw2 = tw2_ref[...]
        tb1 = tb1_ref[...]
        tb2 = tb2_ref[...]
        for b in range(Bb):                                 # static unroll
            lo = b * T
            hb = h[lo:lo + T, :].astype(jnp.bfloat16)       # (T, C) bf16
            t = jnp.dot(tw1, hb,
                        preferred_element_type=jnp.float32)  # (Dt, C) f32
            t = _gelu_exact(t + tb1)
            t = jnp.dot(tw2, t.astype(jnp.bfloat16),
                        preferred_element_type=jnp.float32)  # (T, C) f32
            x1_scr[pl.ds(lo, T), :] = x[lo:lo + T, :] + t + tb2   # residual

        # ---- channel mixer: LN over C, MLP over C on the whole block ----
        x1 = x1_scr[...]                                    # (Bb*T, C) f32
        h2 = _layernorm(x1, ln2_w_ref[...], ln2_b_ref[...])
        c = jnp.dot(h2.astype(jnp.bfloat16), cw1_ref[...],
                    preferred_element_type=jnp.float32)     # (Bb*T, Dc)
        c = _gelu_exact(c + cb1_ref[...])
        c = jnp.dot(c.astype(jnp.bfloat16), cw2_ref[...],
                    preferred_element_type=jnp.float32)     # (Bb*T, C)
        o_ref[...] = (x1 + c + cb2_ref[...]).astype(o_ref.dtype)

    return kernel


def _choose_block_batch(B, T):
    # Aim for ~256 rows in the channel-mixer matmul, but keep >= 2 grid
    # steps so v7x's second TensorCore gets work.
    target = max(1, 256 // max(T, 1))
    bb = min(B, target)
    if B >= 2:
        bb = min(bb, B // 2)
    bb = max(bb, 1)
    while B % bb:
        bb -= 1
    return bb


def mlp_block(x, params, *, block_batch=None):
    """x: (B, T, C) float32.  params: dict of pre-shaped parameter arrays."""
    B, T, C = x.shape
    Dt = params["tw1"].shape[0]
    Dc = params["cw1"].shape[1]

    Bb = _choose_block_batch(B, T) if block_batch is None else block_batch
    assert B % Bb == 0, "block_batch must divide B"
    M = Bb * T
    assert (M % 8 == 0) or (Bb == B), \
        "block rows (Bb*T) must be a multiple of 8 (or cover the full batch)"

    x2d = x.reshape(B * T, C)

    def full(shape):
        nd = len(shape)
        return pl.BlockSpec(shape, lambda i, _nd=nd: (0,) * _nd)

    # Advisory cost estimate so XLA can schedule around the custom call.
    flops = int(4 * B * T * C * (Dt + Dc))
    transcendentals = int(B * (Dt * C + T * Dc))      # one erf per GELU elem
    bytes_accessed = int(
        2 * x2d.size * x2d.dtype.itemsize             # x in + out
        + sum(int(v.size) * v.dtype.itemsize for v in params.values()))

    out2d = pl.pallas_call(
        _make_kernel(Bb, T),
        out_shape=jax.ShapeDtypeStruct((B * T, C), x.dtype),
        grid_spec=pltpu.PrefetchScalarGridSpec(
            num_scalar_prefetch=0,
            grid=(B // Bb,),
            in_specs=[
                pl.BlockSpec((M, C), lambda i: (i, 0)),     # x block
                full((1, C)), full((1, C)),                  # ln1 w, b
                full((Dt, T)), full((Dt, 1)),                # token conv1 w, b
                full((T, Dt)), full((T, 1)),                 # token conv2 w, b
                full((1, C)), full((1, C)),                  # ln2 w, b
                full((C, Dc)), full((1, Dc)),                # channel linear1
                full((Dc, C)), full((1, C)),                 # channel linear2
            ],
            out_specs=pl.BlockSpec((M, C), lambda i: (i, 0)),
            scratch_shapes=[pltpu.VMEM((M, C), jnp.float32)],
        ),
        compiler_params=pltpu.CompilerParams(
            dimension_semantics=("parallel",),
            vmem_limit_bytes=48 * 1024 * 1024),
        cost_estimate=pl.CostEstimate(
            flops=flops,
            transcendentals=transcendentals,
            bytes_accessed=bytes_accessed),
    )(
        x2d,
        params["ln1_w"], params["ln1_b"],
        params["tw1"], params["tb1"],
        params["tw2"], params["tb2"],
        params["ln2_w"], params["ln2_b"],
        params["cw1"], params["cb1"],
        params["cw2"], params["cb2"],
    )
    return out2d.reshape(B, T, C)


def init_params(key, num_tokens, num_channels, token_mlp_dim, channel_mlp_dim):
    ks = jax.random.split(key, 8)
    f32, bf16 = jnp.float32, jnp.bfloat16
    # LayerNorm: weight=1, bias=0 (PyTorch default), reshaped to (1, C).
    ln1_w = jnp.ones((1, num_channels), f32)
    ln1_b = jnp.zeros((1, num_channels), f32)
    ln2_w = jnp.ones((1, num_channels), f32)
    ln2_b = jnp.zeros((1, num_channels), f32)
    # Conv1d(num_tokens -> token_mlp_dim, k=1): weight (out, in, 1) -> (out, in).
    # Matmul weights stored in bf16 (MXU operands); biases stay f32.
    tw1 = (jax.random.normal(ks[0], (token_mlp_dim, num_tokens), f32) * 0.05).astype(bf16)
    tb1 = jax.random.normal(ks[1], (token_mlp_dim, 1), f32) * 0.05
    tw2 = (jax.random.normal(ks[2], (num_tokens, token_mlp_dim), f32) * 0.05).astype(bf16)
    tb2 = jax.random.normal(ks[3], (num_tokens, 1), f32) * 0.05
    # Linear(C -> Dc): PyTorch weight is (out, in); pre-transposed to (in, out).
    cw1 = (jax.random.normal(ks[4], (num_channels, channel_mlp_dim), f32) * 0.05).astype(bf16)
    cb1 = jax.random.normal(ks[5], (1, channel_mlp_dim), f32) * 0.05
    cw2 = (jax.random.normal(ks[6], (channel_mlp_dim, num_channels), f32) * 0.05).astype(bf16)
    cb2 = jax.random.normal(ks[7], (1, num_channels), f32) * 0.05
    return dict(ln1_w=ln1_w, ln1_b=ln1_b, tw1=tw1, tb1=tb1, tw2=tw2, tb2=tb2,
                ln2_w=ln2_w, ln2_b=ln2_b, cw1=cw1, cb1=cb1, cw2=cw2, cb2=cb2)


def mlp_block_ref(x, p):
    """Pure-JAX f32 reference mirroring the PyTorch forward (eval mode)."""
    def up(a):
        return a.astype(jnp.float32)

    def ln(v, w, b):
        mu = jnp.mean(v, axis=-1, keepdims=True)
        var = jnp.mean((v - mu) ** 2, axis=-1, keepdims=True)
        return (v - mu) / jnp.sqrt(var + _LN_EPS) * w + b

    def gelu(v):
        return 0.5 * v * (1.0 + jax.lax.erf(v * _INV_SQRT2))

    h = ln(x, p["ln1_w"], p["ln1_b"])
    t = jnp.einsum("ot,btc->boc", up(p["tw1"]), h) + p["tb1"][None]
    t = jnp.einsum("to,boc->btc", up(p["tw2"]), gelu(t)) + p["tb2"][None]
    x1 = x + t
    h2 = ln(x1, p["ln2_w"], p["ln2_b"])
    c = gelu(h2 @ up(p["cw1"]) + p["cb1"]) @ up(p["cw2"]) + p["cb2"]
    return x1 + c


if __name__ == "__main__":
    # Small but lane/MXU-friendly demo shapes: C = 128 lanes, Bb*T mult of 8.
    B, T, C = 8, 8, 128          # batch, num_tokens, num_channels
    Dt, Dc = 32, 256             # token_mlp_dim, channel_mlp_dim

    key = jax.random.PRNGKey(0)
    kx, kp = jax.random.split(key)
    x = jax.random.normal(kx, (B, T, C), jnp.float32)
    params = init_params(kp, T, C, Dt, Dc)

    out = jax.block_until_ready(mlp_block(x, params))

    ref = mlp_block_ref(x, params)
    assert out.shape == (B, T, C)
    max_err = float(jnp.max(jnp.abs(out - ref)))
    # bf16 MXU operands with f32 accumulation -> loosened tolerance vs f32 ref.
    assert jnp.allclose(out, ref, rtol=2e-2, atol=2e-2), \
        f"mismatch vs reference (max abs err {max_err})"

    print("KERNEL_OK")
</pallas_src>

<mosaic_0001>
module attributes {stable_mosaic.version = 11 : i64} {
  func.func @kernel(%arg0: i32, %arg1: memref<32x128xf32, #tpu.memory_space<vmem>>, %arg2: memref<1x128xf32, #tpu.memory_space<vmem>>, %arg3: memref<1x128xf32, #tpu.memory_space<vmem>>, %arg4: memref<32x8xbf16, #tpu.memory_space<vmem>>, %arg5: memref<32x1xf32, #tpu.memory_space<vmem>>, %arg6: memref<8x32xbf16, #tpu.memory_space<vmem>>, %arg7: memref<8x1xf32, #tpu.memory_space<vmem>>, %arg8: memref<1x128xf32, #tpu.memory_space<vmem>>, %arg9: memref<1x128xf32, #tpu.memory_space<vmem>>, %arg10: memref<128x256xbf16, #tpu.memory_space<vmem>>, %arg11: memref<1x256xf32, #tpu.memory_space<vmem>>, %arg12: memref<256x128xbf16, #tpu.memory_space<vmem>>, %arg13: memref<1x128xf32, #tpu.memory_space<vmem>>, %arg14: memref<32x128xf32, #tpu.memory_space<vmem>>, %arg15: memref<32x128xf32, #tpu.memory_space<vmem>>) attributes {dimension_semantics = [#tpu.dimension_semantics<parallel>], iteration_bounds = array<i64: 2>, scalar_prefetch = 0 : i64, scratch_operands = 1 : i64, tpu.core_type = #tpu.core_type<tc>, window_params = [{transform_indices = @transform_0, window_bounds = array<i64: 32, 128>}, {pipeline_mode = #tpu.pipeline_mode<synchronous>, transform_indices = @transform_1, window_bounds = array<i64: 1, 128>}, {pipeline_mode = #tpu.pipeline_mode<synchronous>, transform_indices = @transform_2, window_bounds = array<i64: 1, 128>}, {pipeline_mode = #tpu.pipeline_mode<synchronous>, transform_indices = @transform_3, window_bounds = array<i64: 32, 8>}, {pipeline_mode = #tpu.pipeline_mode<synchronous>, transform_indices = @transform_4, window_bounds = array<i64: 32, 1>}, {pipeline_mode = #tpu.pipeline_mode<synchronous>, transform_indices = @transform_5, window_bounds = array<i64: 8, 32>}, {pipeline_mode = #tpu.pipeline_mode<synchronous>, transform_indices = @transform_6, window_bounds = array<i64: 8, 1>}, {pipeline_mode = #tpu.pipeline_mode<synchronous>, transform_indices = @transform_7, window_bounds = array<i64: 1, 128>}, {pipeline_mode = #tpu.pipeline_mode<synchronous>, transform_indices = @transform_8, window_bounds = array<i64: 1, 128>}, {pipeline_mode = #tpu.pipeline_mode<synchronous>, transform_indices = @transform_9, window_bounds = array<i64: 128, 256>}, {pipeline_mode = #tpu.pipeline_mode<synchronous>, transform_indices = @transform_10, window_bounds = array<i64: 1, 256>}, {pipeline_mode = #tpu.pipeline_mode<synchronous>, transform_indices = @transform_11, window_bounds = array<i64: 256, 128>}, {pipeline_mode = #tpu.pipeline_mode<synchronous>, transform_indices = @transform_12, window_bounds = array<i64: 1, 128>}, {transform_indices = @transform_13, window_bounds = array<i64: 32, 128>}]} {
    %c0 = arith.constant 0 : index
    %c0_0 = arith.constant 0 : index
    %0 = vector.load %arg1[%c0, %c0_0] : memref<32x128xf32, #tpu.memory_space<vmem>>, vector<32x128xf32>
    %c0_1 = arith.constant 0 : index
    %c0_2 = arith.constant 0 : index
    %1 = vector.load %arg2[%c0_1, %c0_2] : memref<1x128xf32, #tpu.memory_space<vmem>>, vector<1x128xf32>
    %c0_3 = arith.constant 0 : index
    %c0_4 = arith.constant 0 : index
    %2 = vector.load %arg3[%c0_3, %c0_4] : memref<1x128xf32, #tpu.memory_space<vmem>>, vector<1x128xf32>
    %cst = arith.constant dense<0.000000e+00> : vector<32xf32>
    %3 = vector.multi_reduction <add>, %0, %cst [1] : vector<32x128xf32> to vector<32xf32>
    %4 = vector.shape_cast %3 : vector<32xf32> to vector<32x1xf32>
    %cst_5 = arith.constant 1.280000e+02 : f32
    %5 = vector.broadcast %cst_5 : f32 to vector<32x1xf32>
    %6 = arith.divf %4, %5 : vector<32x1xf32>
    %7 = vector.broadcast %6 : vector<32x1xf32> to vector<32x128xf32>
    %8 = arith.subf %0, %7 : vector<32x128xf32>
    %9 = arith.mulf %8, %8 : vector<32x128xf32>
    %cst_6 = arith.constant dense<0.000000e+00> : vector<32xf32>
    %10 = vector.multi_reduction <add>, %9, %cst_6 [1] : vector<32x128xf32> to vector<32xf32>
    %11 = vector.shape_cast %10 : vector<32xf32> to vector<32x1xf32>
    %cst_7 = arith.constant 1.280000e+02 : f32
    %12 = vector.broadcast %cst_7 : f32 to vector<32x1xf32>
    %13 = arith.divf %11, %12 : vector<32x1xf32>
    %14 = vector.broadcast %6 : vector<32x1xf32> to vector<32x128xf32>
    %15 = arith.subf %0, %14 : vector<32x128xf32>
    %cst_8 = arith.constant 9.99999974E-6 : f32
    %16 = vector.broadcast %cst_8 : f32 to vector<32x1xf32>
    %17 = arith.addf %13, %16 : vector<32x1xf32>
    %18 = math.rsqrt %17 : vector<32x1xf32>
    %19 = vector.broadcast %18 : vector<32x1xf32> to vector<32x128xf32>
    %20 = arith.mulf %15, %19 : vector<32x128xf32>
    %21 = vector.broadcast %1 : vector<1x128xf32> to vector<32x128xf32>
    %22 = arith.mulf %20, %21 : vector<32x128xf32>
    %23 = vector.broadcast %2 : vector<1x128xf32> to vector<32x128xf32>
    %24 = arith.addf %22, %23 : vector<32x128xf32>
    %c0_9 = arith.constant 0 : index
    %c0_10 = arith.constant 0 : index
    %25 = vector.load %arg4[%c0_9, %c0_10] : memref<32x8xbf16, #tpu.memory_space<vmem>>, vector<32x8xbf16>
    %c0_11 = arith.constant 0 : index
    %c0_12 = arith.constant 0 : index
    %26 = vector.load %arg6[%c0_11, %c0_12] : memref<8x32xbf16, #tpu.memory_space<vmem>>, vector<8x32xbf16>
    %c0_13 = arith.constant 0 : index
    %c0_14 = arith.constant 0 : index
    %27 = vector.load %arg5[%c0_13, %c0_14] : memref<32x1xf32, #tpu.memory_space<vmem>>, vector<32x1xf32>
    %c0_15 = arith.constant 0 : index
    %c0_16 = arith.constant 0 : index
    %28 = vector.load %arg7[%c0_15, %c0_16] : memref<8x1xf32, #tpu.memory_space<vmem>>, vector<8x1xf32>
    %29 = vector.extract_strided_slice %24 {offsets = [0, 0], sizes = [8, 128], strides = [1, 1]} : vector<32x128xf32> to vector<8x128xf32>
    %30 = arith.truncf %29 : vector<8x128xf32> to vector<8x128xbf16>
    %cst_17 = arith.constant dense<0.000000e+00> : vector<32x128xf32>
    %31 = tpu.matmul %25, %30, %cst_17 {dimension_numbers = #tpu.dot_dimension_numbers<[1], [0], [0], [1], [0, 0, 1, 1], [], []>} : vector<32x8xbf16>, vector<8x128xbf16>, vector<32x128xf32> -> vector<32x128xf32>
    %32 = vector.broadcast %27 : vector<32x1xf32> to vector<32x128xf32>
    %33 = arith.addf %31, %32 : vector<32x128xf32>
    %cst_18 = arith.constant 5.000000e-01 : f32
    %34 = vector.broadcast %cst_18 : f32 to vector<32x128xf32>
    %35 = arith.mulf %34, %33 : vector<32x128xf32>
    %cst_19 = arith.constant 0.707106769 : f32
    %36 = vector.broadcast %cst_19 : f32 to vector<32x128xf32>
    %37 = arith.mulf %33, %36 : vector<32x128xf32>
    %38 = math.erf %37 : vector<32x128xf32>
    %cst_20 = arith.constant 1.000000e+00 : f32
    %39 = vector.broadcast %cst_20 : f32 to vector<32x128xf32>
    %40 = arith.addf %39, %38 : vector<32x128xf32>
    %41 = arith.mulf %35, %40 : vector<32x128xf32>
    %42 = arith.truncf %41 : vector<32x128xf32> to vector<32x128xbf16>
    %cst_21 = arith.constant dense<0.000000e+00> : vector<8x128xf32>
    %43 = tpu.matmul %26, %42, %cst_21 {dimension_numbers = #tpu.dot_dimension_numbers<[1], [0], [0], [1], [0, 0, 1, 1], [], []>} : vector<8x32xbf16>, vector<32x128xbf16>, vector<8x128xf32> -> vector<8x128xf32>
    %44 = vector.extract_strided_slice %0 {offsets = [0, 0], sizes = [8, 128], strides = [1, 1]} : vector<32x128xf32> to vector<8x128xf32>
    %45 = arith.addf %44, %43 : vector<8x128xf32>
    %46 = vector.broadcast %28 : vector<8x1xf32> to vector<8x128xf32>
    %47 = arith.addf %45, %46 : vector<8x128xf32>
    %c0_22 = arith.constant 0 : index
    %c0_23 = arith.constant 0 : index
    %48 = vector.load %arg15[%c0_22, %c0_23] : memref<32x128xf32, #tpu.memory_space<vmem>>, vector<8x128xf32>
    tpu.vector_store %arg15[%c0_22, %c0_23], %47 {strides = array<i32>} : memref<32x128xf32, #tpu.memory_space<vmem>>, vector<8x128xf32>,
    %49 = vector.extract_strided_slice %24 {offsets = [8, 0], sizes = [8, 128], strides = [1, 1]} : vector<32x128xf32> to vector<8x128xf32>
    %50 = arith.truncf %49 : vector<8x128xf32> to vector<8x128xbf16>
    %cst_24 = arith.constant dense<0.000000e+00> : vector<32x128xf32>
    %51 = tpu.matmul %25, %50, %cst_24 {dimension_numbers = #tpu.dot_dimension_numbers<[1], [0], [0], [1], [0, 0, 1, 1], [], []>} : vector<32x8xbf16>, vector<8x128xbf16>, vector<32x128xf32> -> vector<32x128xf32>
    %52 = vector.broadcast %27 : vector<32x1xf32> to vector<32x128xf32>
    %53 = arith.addf %51, %52 : vector<32x128xf32>
    %cst_25 = arith.constant 5.000000e-01 : f32
    %54 = vector.broadcast %cst_25 : f32 to vector<32x128xf32>
    %55 = arith.mulf %54, %53 : vector<32x128xf32>
    %cst_26 = arith.constant 0.707106769 : f32
    %56 = vector.broadcast %cst_26 : f32 to vector<32x128xf32>
    %57 = arith.mulf %53, %56 : vector<32x128xf32>
    %58 = math.erf %57 : vector<32x128xf32>
    %cst_27 = arith.constant 1.000000e+00 : f32
    %59 = vector.broadcast %cst_27 : f32 to vector<32x128xf32>
    %60 = arith.addf %59, %58 : vector<32x128xf32>
    %61 = arith.mulf %55, %60 : vector<32x128xf32>
    %62 = arith.truncf %61 : vector<32x128xf32> to vector<32x128xbf16>
    %cst_28 = arith.constant dense<0.000000e+00> : vector<8x128xf32>
    %63 = tpu.matmul %26, %62, %cst_28 {dimension_numbers = #tpu.dot_dimension_numbers<[1], [0], [0], [1], [0, 0, 1, 1], [], []>} : vector<8x32xbf16>, vector<32x128xbf16>, vector<8x128xf32> -> vector<8x128xf32>
    %64 = vector.extract_strided_slice %0 {offsets = [8, 0], sizes = [8, 128], strides = [1, 1]} : vector<32x128xf32> to vector<8x128xf32>
    %65 = arith.addf %64, %63 : vector<8x128xf32>
    %66 = vector.broadcast %28 : vector<8x1xf32> to vector<8x128xf32>
    %67 = arith.addf %65, %66 : vector<8x128xf32>
    %c8 = arith.constant 8 : index
    %c0_29 = arith.constant 0 : index
    %68 = vector.load %arg15[%c8, %c0_29] : memref<32x128xf32, #tpu.memory_space<vmem>>, vector<8x128xf32>
    tpu.vector_store %arg15[%c8, %c0_29], %67 {strides = array<i32>} : memref<32x128xf32, #tpu.memory_space<vmem>>, vector<8x128xf32>,
    %69 = vector.extract_strided_slice %24 {offsets = [16, 0], sizes = [8, 128], strides = [1, 1]} : vector<32x128xf32> to vector<8x128xf32>
    %70 = arith.truncf %69 : vector<8x128xf32> to vector<8x128xbf16>
    %cst_30 = arith.constant dense<0.000000e+00> : vector<32x128xf32>
    %71 = tpu.matmul %25, %70, %cst_30 {dimension_numbers = #tpu.dot_dimension_numbers<[1], [0], [0], [1], [0, 0, 1, 1], [], []>} : vector<32x8xbf16>, vector<8x128xbf16>, vector<32x128xf32> -> vector<32x128xf32>
    %72 = vector.broadcast %27 : vector<32x1xf32> to vector<32x128xf32>
    %73 = arith.addf %71, %72 : vector<32x128xf32>
    %cst_31 = arith.constant 5.000000e-01 : f32
    %74 = vector.broadcast %cst_31 : f32 to vector<32x128xf32>
    %75 = arith.mulf %74, %73 : vector<32x128xf32>
    %cst_32 = arith.constant 0.707106769 : f32
    %76 = vector.broadcast %cst_32 : f32 to vector<32x128xf32>
    %77 = arith.mulf %73, %76 : vector<32x128xf32>
    %78 = math.erf %77 : vector<32x128xf32>
    %cst_33 = arith.constant 1.000000e+00 : f32
    %79 = vector.broadcast %cst_33 : f32 to vector<32x128xf32>
    %80 = arith.addf %79, %78 : vector<32x128xf32>
    %81 = arith.mulf %75, %80 : vector<32x128xf32>
    %82 = arith.truncf %81 : vector<32x128xf32> to vector<32x128xbf16>
    %cst_34 = arith.constant dense<0.000000e+00> : vector<8x128xf32>
    %83 = tpu.matmul %26, %82, %cst_34 {dimension_numbers = #tpu.dot_dimension_numbers<[1], [0], [0], [1], [0, 0, 1, 1], [], []>} : vector<8x32xbf16>, vector<32x128xbf16>, vector<8x128xf32> -> vector<8x128xf32>
    %84 = vector.extract_strided_slice %0 {offsets = [16, 0], sizes = [8, 128], strides = [1, 1]} : vector<32x128xf32> to vector<8x128xf32>
    %85 = arith.addf %84, %83 : vector<8x128xf32>
    %86 = vector.broadcast %28 : vector<8x1xf32> to vector<8x128xf32>
    %87 = arith.addf %85, %86 : vector<8x128xf32>
    %c16 = arith.constant 16 : index
    %c0_35 = arith.constant 0 : index
    %88 = vector.load %arg15[%c16, %c0_35] : memref<32x128xf32, #tpu.memory_space<vmem>>, vector<8x128xf32>
    tpu.vector_store %arg15[%c16, %c0_35], %87 {strides = array<i32>} : memref<32x128xf32, #tpu.memory_space<vmem>>, vector<8x128xf32>,
    %89 = vector.extract_strided_slice %24 {offsets = [24, 0], sizes = [8, 128], strides = [1, 1]} : vector<32x128xf32> to vector<8x128xf32>
    %90 = arith.truncf %89 : vector<8x128xf32> to vector<8x128xbf16>
    %cst_36 = arith.constant dense<0.000000e+00> : vector<32x128xf32>
    %91 = tpu.matmul %25, %90, %cst_36 {dimension_numbers = #tpu.dot_dimension_numbers<[1], [0], [0], [1], [0, 0, 1, 1], [], []>} : vector<32x8xbf16>, vector<8x128xbf16>, vector<32x128xf32> -> vector<32x128xf32>
    %92 = vector.broadcast %27 : vector<32x1xf32> to vector<32x128xf32>
    %93 = arith.addf %91, %92 : vector<32x128xf32>
    %cst_37 = arith.constant 5.000000e-01 : f32
    %94 = vector.broadcast %cst_37 : f32 to vector<32x128xf32>
    %95 = arith.mulf %94, %93 : vector<32x128xf32>
    %cst_38 = arith.constant 0.707106769 : f32
    %96 = vector.broadcast %cst_38 : f32 to vector<32x128xf32>
    %97 = arith.mulf %93, %96 : vector<32x128xf32>
    %98 = math.erf %97 : vector<32x128xf32>
    %cst_39 = arith.constant 1.000000e+00 : f32
    %99 = vector.broadcast %cst_39 : f32 to vector<32x128xf32>
    %100 = arith.addf %99, %98 : vector<32x128xf32>
    %101 = arith.mulf %95, %100 : vector<32x128xf32>
    %102 = arith.truncf %101 : vector<32x128xf32> to vector<32x128xbf16>
    %cst_40 = arith.constant dense<0.000000e+00> : vector<8x128xf32>
    %103 = tpu.matmul %26, %102, %cst_40 {dimension_numbers = #tpu.dot_dimension_numbers<[1], [0], [0], [1], [0, 0, 1, 1], [], []>} : vector<8x32xbf16>, vector<32x128xbf16>, vector<8x128xf32> -> vector<8x128xf32>
    %104 = vector.extract_strided_slice %0 {offsets = [24, 0], sizes = [8, 128], strides = [1, 1]} : vector<32x128xf32> to vector<8x128xf32>
    %105 = arith.addf %104, %103 : vector<8x128xf32>
    %106 = vector.broadcast %28 : vector<8x1xf32> to vector<8x128xf32>
    %107 = arith.addf %105, %106 : vector<8x128xf32>
    %c24 = arith.constant 24 : index
    %c0_41 = arith.constant 0 : index
    %108 = vector.load %arg15[%c24, %c0_41] : memref<32x128xf32, #tpu.memory_space<vmem>>, vector<8x128xf32>
    tpu.vector_store %arg15[%c24, %c0_41], %107 {strides = array<i32>} : memref<32x128xf32, #tpu.memory_space<vmem>>, vector<8x128xf32>,
    %c0_42 = arith.constant 0 : index
    %c0_43 = arith.constant 0 : index
    %109 = vector.load %arg15[%c0_42, %c0_43] : memref<32x128xf32, #tpu.memory_space<vmem>>, vector<32x128xf32>
    %c0_44 = arith.constant 0 : index
    %c0_45 = arith.constant 0 : index
    %110 = vector.load %arg8[%c0_44, %c0_45] : memref<1x128xf32, #tpu.memory_space<vmem>>, vector<1x128xf32>
    %c0_46 = arith.constant 0 : index
    %c0_47 = arith.constant 0 : index
    %111 = vector.load %arg9[%c0_46, %c0_47] : memref<1x128xf32, #tpu.memory_space<vmem>>, vector<1x128xf32>
    %cst_48 = arith.constant dense<0.000000e+00> : vector<32xf32>
    %112 = vector.multi_reduction <add>, %109, %cst_48 [1] : vector<32x128xf32> to vector<32xf32>
    %113 = vector.shape_cast %112 : vector<32xf32> to vector<32x1xf32>
    %cst_49 = arith.constant 1.280000e+02 : f32
    %114 = vector.broadcast %cst_49 : f32 to vector<32x1xf32>
    %115 = arith.divf %113, %114 : vector<32x1xf32>
    %116 = vector.broadcast %115 : vector<32x1xf32> to vector<32x128xf32>
    %117 = arith.subf %109, %116 : vector<32x128xf32>
    %118 = arith.mulf %117, %117 : vector<32x128xf32>
    %cst_50 = arith.constant dense<0.000000e+00> : vector<32xf32>
    %119 = vector.multi_reduction <add>, %118, %cst_50 [1] : vector<32x128xf32> to vector<32xf32>
    %120 = vector.shape_cast %119 : vector<32xf32> to vector<32x1xf32>
    %cst_51 = arith.constant 1.280000e+02 : f32
    %121 = vector.broadcast %cst_51 : f32 to vector<32x1xf32>
    %122 = arith.divf %120, %121 : vector<32x1xf32>
    %123 = vector.broadcast %115 : vector<32x1xf32> to vector<32x128xf32>
    %124 = arith.subf %109, %123 : vector<32x128xf32>
    %cst_52 = arith.constant 9.99999974E-6 : f32
    %125 = vector.broadcast %cst_52 : f32 to vector<32x1xf32>
    %126 = arith.addf %122, %125 : vector<32x1xf32>
    %127 = math.rsqrt %126 : vector<32x1xf32>
    %128 = vector.broadcast %127 : vector<32x1xf32> to vector<32x128xf32>
    %129 = arith.mulf %124, %128 : vector<32x128xf32>
    %130 = vector.broadcast %110 : vector<1x128xf32> to vector<32x128xf32>
    %131 = arith.mulf %129, %130 : vector<32x128xf32>
    %132 = vector.broadcast %111 : vector<1x128xf32> to vector<32x128xf32>
    %133 = arith.addf %131, %132 : vector<32x128xf32>
    %134 = arith.truncf %133 : vector<32x128xf32> to vector<32x128xbf16>
    %c0_53 = arith.constant 0 : index
    %c0_54 = arith.constant 0 : index
    %135 = vector.load %arg10[%c0_53, %c0_54] : memref<128x256xbf16, #tpu.memory_space<vmem>>, vector<128x256xbf16>
    %cst_55 = arith.constant dense<0.000000e+00> : vector<32x256xf32>
    %136 = tpu.matmul %134, %135, %cst_55 {dimension_numbers = #tpu.dot_dimension_numbers<[1], [0], [0], [1], [0, 0, 1, 1], [], []>} : vector<32x128xbf16>, vector<128x256xbf16>, vector<32x256xf32> -> vector<32x256xf32>
    %c0_56 = arith.constant 0 : index
    %c0_57 = arith.constant 0 : index
    %137 = vector.load %arg11[%c0_56, %c0_57] : memref<1x256xf32, #tpu.memory_space<vmem>>, vector<1x256xf32>
    %138 = vector.broadcast %137 : vector<1x256xf32> to vector<32x256xf32>
    %139 = arith.addf %136, %138 : vector<32x256xf32>
    %cst_58 = arith.constant 5.000000e-01 : f32
    %140 = vector.broadcast %cst_58 : f32 to vector<32x256xf32>
    %141 = arith.mulf %140, %139 : vector<32x256xf32>
    %cst_59 = arith.constant 0.707106769 : f32
    %142 = vector.broadcast %cst_59 : f32 to vector<32x256xf32>
    %143 = arith.mulf %139, %142 : vector<32x256xf32>
    %144 = math.erf %143 : vector<32x256xf32>
    %cst_60 = arith.constant 1.000000e+00 : f32
    %145 = vector.broadcast %cst_60 : f32 to vector<32x256xf32>
    %146 = arith.addf %145, %144 : vector<32x256xf32>
    %147 = arith.mulf %141, %146 : vector<32x256xf32>
    %148 = arith.truncf %147 : vector<32x256xf32> to vector<32x256xbf16>
    %c0_61 = arith.constant 0 : index
    %c0_62 = arith.constant 0 : index
    %149 = vector.load %arg12[%c0_61, %c0_62] : memref<256x128xbf16, #tpu.memory_space<vmem>>, vector<256x128xbf16>
    %cst_63 = arith.constant dense<0.000000e+00> : vector<32x128xf32>
    %150 = tpu.matmul %148, %149, %cst_63 {dimension_numbers = #tpu.dot_dimension_numbers<[1], [0], [0], [1], [0, 0, 1, 1], [], []>} : vector<32x256xbf16>, vector<256x128xbf16>, vector<32x128xf32> -> vector<32x128xf32>
    %151 = arith.addf %109, %150 : vector<32x128xf32>
    %c0_64 = arith.constant 0 : index
    %c0_65 = arith.constant 0 : index
    %152 = vector.load %arg13[%c0_64, %c0_65] : memref<1x128xf32, #tpu.memory_space<vmem>>, vector<1x128xf32>
    %153 = vector.broadcast %152 : vector<1x128xf32> to vector<32x128xf32>
    %154 = arith.addf %151, %153 : vector<32x128xf32>
    %c0_66 = arith.constant 0 : index
    %c0_67 = arith.constant 0 : index
    %155 = vector.load %arg14[%c0_66, %c0_67] : memref<32x128xf32, #tpu.memory_space<vmem>>, vector<32x128xf32>
    tpu.vector_store %arg14[%c0_66, %c0_67], %154 {strides = array<i32>} : memref<32x128xf32, #tpu.memory_space<vmem>>, vector<32x128xf32>,
    return
  }
  func.func @transform_0(%arg0: i32) -> (i32, i32) {
    %c0_i32 = arith.constant 0 : i32
    %c0_i32_0 = arith.constant 0 : i32
    return %arg0, %c0_i32 : i32, i32
  }
  func.func @transform_1(%arg0: i32) -> (i32, i32) {
    %c0_i32 = arith.constant 0 : i32
    %c0_i32_0 = arith.constant 0 : i32
    %c0_i32_1 = arith.constant 0 : i32
    return %c0_i32, %c0_i32_0 : i32, i32
  }
  func.func @transform_2(%arg0: i32) -> (i32, i32) {
    %c0_i32 = arith.constant 0 : i32
    %c0_i32_0 = arith.constant 0 : i32
    %c0_i32_1 = arith.constant 0 : i32
    return %c0_i32, %c0_i32_0 : i32, i32
  }
  func.func @transform_3(%arg0: i32) -> (i32, i32) {
    %c0_i32 = arith.constant 0 : i32
    %c0_i32_0 = arith.constant 0 : i32
    %c0_i32_1 = arith.constant 0 : i32
    return %c0_i32, %c0_i32_0 : i32, i32
  }
  func.func @transform_4(%arg0: i32) -> (i32, i32) {
    %c0_i32 = arith.constant 0 : i32
    %c0_i32_0 = arith.constant 0 : i32
    %c0_i32_1 = arith.constant 0 : i32
    return %c0_i32, %c0_i32_0 : i32, i32
  }
  func.func @transform_5(%arg0: i32) -> (i32, i32) {
    %c0_i32 = arith.constant 0 : i32
    %c0_i32_0 = arith.constant 0 : i32
    %c0_i32_1 = arith.constant 0 : i32
    return %c0_i32, %c0_i32_0 : i32, i32
  }
  func.func @transform_6(%arg0: i32) -> (i32, i32) {
    %c0_i32 = arith.constant 0 : i32
    %c0_i32_0 = arith.constant 0 : i32
    %c0_i32_1 = arith.constant 0 : i32
    return %c0_i32, %c0_i32_0 : i32, i32
  }
  func.func @transform_7(%arg0: i32) -> (i32, i32) {
    %c0_i32 = arith.constant 0 : i32
    %c0_i32_0 = arith.constant 0 : i32
    %c0_i32_1 = arith.constant 0 : i32
    return %c0_i32, %c0_i32_0 : i32, i32
  }
  func.func @transform_8(%arg0: i32) -> (i32, i32) {
    %c0_i32 = arith.constant 0 : i32
    %c0_i32_0 = arith.constant 0 : i32
    %c0_i32_1 = arith.constant 0 : i32
    return %c0_i32, %c0_i32_0 : i32, i32
  }
  func.func @transform_9(%arg0: i32) -> (i32, i32) {
    %c0_i32 = arith.constant 0 : i32
    %c0_i32_0 = arith.constant 0 : i32
    %c0_i32_1 = arith.constant 0 : i32
    return %c0_i32, %c0_i32_0 : i32, i32
  }
  func.func @transform_10(%arg0: i32) -> (i32, i32) {
    %c0_i32 = arith.constant 0 : i32
    %c0_i32_0 = arith.constant 0 : i32
    %c0_i32_1 = arith.constant 0 : i32
    return %c0_i32, %c0_i32_0 : i32, i32
  }
  func.func @transform_11(%arg0: i32) -> (i32, i32) {
    %c0_i32 = arith.constant 0 : i32
    %c0_i32_0 = arith.constant 0 : i32
    %c0_i32_1 = arith.constant 0 : i32
    return %c0_i32, %c0_i32_0 : i32, i32
  }
  func.func @transform_12(%arg0: i32) -> (i32, i32) {
    %c0_i32 = arith.constant 0 : i32
    %c0_i32_0 = arith.constant 0 : i32
    %c0_i32_1 = arith.constant 0 : i32
    return %c0_i32, %c0_i32_0 : i32, i32
  }
  func.func @transform_13(%arg0: i32) -> (i32, i32) {
    %c0_i32 = arith.constant 0 : i32
    %c0_i32_0 = arith.constant 0 : i32
    return %arg0, %c0_i32 : i32, i32
  }
}

</mosaic_0001>

<bundles_post_ra>
// kernel: tpu_custom_call.1
= control target key start
LH: loop header
LB: loop body
LE: loop exit
PB: predicated region body
PF: predicated region fallthrough
CT: control target
= control target key end

     0   :  { %s2718_s0 = inlined_call_operand.hbm [shape: f32[64,128], index: 0, kind: input, shape index: {}]   ;;  %s2719_s1 = inlined_call_operand.vmem [shape: f32[1,128], index: 1, kind: input, shape index: {}]   ;;  %s2720_s2 = inlined_call_operand.vmem [shape: f32[1,128], index: 2, kind: input, shape index: {}]   ;;  %s2721_s3 = inlined_call_operand.vmem [shape: bf16[32,8], index: 3, kind: input, shape index: {}]   ;;  %s2722_s4 = inlined_call_operand.vmem [shape: f32[32,1], index: 4, kind: input, shape index: {}]   ;;  %s2723_s5 = inlined_call_operand.vmem [shape: bf16[8,32], index: 5, kind: input, shape index: {}]   ;;  %s2724_s6 = inlined_call_operand.vmem [shape: f32[8,1], index: 6, kind: input, shape index: {}]   ;;  %s2725_s7 = inlined_call_operand.vmem [shape: f32[1,128], index: 7, kind: input, shape index: {}]   ;;  %s2726_s8 = inlined_call_operand.vmem [shape: f32[1,128], index: 8, kind: input, shape index: {}]   ;;  %s2727_s9 = inlined_call_operand.hbm [shape: bf16[128,256], index: 9, kind: input, shape index: {}]   ;;  %s2728_s10 = inlined_call_operand.vmem [shape: f32[1,256], index: 10, kind: input, shape index: {}]   ;;  %s2729_s11 = inlined_call_operand.hbm [shape: bf16[256,128], index: 11, kind: input, shape index: {}]   ;;  %s2730_s12 = inlined_call_operand.vmem [shape: f32[1,128], index: 12, kind: input, shape index: {}]   ;;  %s2731_s13 = inlined_call_operand.hbm [shape: f32[64,128], index: 13, kind: output, shape index: {}]  }
   0x1   :  { %2740 = sst [smem:[#allocation15_spill]] %s2728_s10 }
   0x2   :  { %2741 = sst [smem:[#allocation16_spill]] %s2730_s12 }
   0x3   :  { %2742 = sst [smem:[#allocation17_spill]] %s2731_s13 }
   0x4   :  { %18 = vsyncpa [#allocation4], 0 }
   0x5   :  { %20 = vsyncpa [#allocation4 + $0x1], 0 }
   0x6   :  { %21 = vsyncpa [#allocation7], 0 }
   0x7   :  { %22 = vsyncpa [#allocation5], 0 }
   0x8   :  { %24 = vsyncpa [#allocation5 + $0x1], 0  ;;  %s2278_s25 = smov 0   ;;  %s2280_s26 = smov 0  }
   0x9   :  { %s2282_s27 = smov 0   ;;  %s2284_s28 = smov 0  }
   0xa LB: > { %2743 = sst [smem:[#allocation13_spill]] %s2181_s25  ;;  %s2299_s29 = sadd.s32 4294967295, %s2193_s28   ;;  %s2193_s28 = sphi %s2284_s28, %s2768_s28   ;;  %s2189_s27 = sphi %s2282_s27, %s2767_s27   ;;  %s2185_s26 = sphi %s2280_s26, %s2766_s26   ;;  %s2181_s25 = sphi %s2278_s25, %s2765_s25  }
   0xb   : > { %s1670_s30 = sadd.s32 4294967294, %s2193_s28   ;;  %p50_p0 = scmp.ne.s32.totalorder %s2185_s26, %s2181_s25 }
   0xc   : > { %p2734_p1 = scmp.eq.s32.totalorder %s2299_s29, 0  ;;  %p332_p3 = scmp.eq.s32.totalorder %s1670_s30, 1 }
   0xd   : > { %p1671_p5 = scmp.ge.s32.totalorder %s2193_s28, 1  ;;  %p339_p7 = scmp.lt.s32.totalorder %s2193_s28, 3 }
   0xe   : > { %p2308_p4 = por %p2734_p1, %p50_p0  ;;  %p2313_p6 = por %p332_p3, %p50_p0 }
   0xf   : > { %p2318_p8 = pnand %p1671_p5, %p339_p7  ;;  %s2195_s17 = smov [#allocation6]  }
  0x10   : > { %s2744_s14 = scalar_select %p2308_p4, 1, 0 }
  0x11   : > { %s2745_s15 = scalar_select %p2313_p6, 1, 0 }
  0x12   : > { %s375_s18 = sshll.u32 %s2195_s17, 4  ;;  %p1865_p9 = pneg %p2318_p8  ;;  %s2322_s18 = int_to_ptr.vmem [resolvable:$true] %s375_s18 }
  0x13   : > { %2746 = sst [smem:[#allocation14_spill]] %s2745_s15  ;;  %s2196_s20 = smov [#allocation8]  }
  0x14   : > { %p2329_p11 = pnand %p1865_p9, %p2734_p1  ;;  %s391_s21 = sshll.u32 %s2196_s20, 4  ;;  %s2333_s21 = int_to_ptr.vmem [resolvable:$true] %s391_s21 }
  0x15   : > { %s2037_s24 = scalar_lea.hbm %s2727_s9, 2048 }
  0x16   : > { %p2038_p12 = scmp.ne.s32.totalorder %s2727_s9, %s2037_s24  ;;  %p2039_p13 = pneg %p2329_p11 }
  0x17   : > { %p2044_p5 = scmp.lt.u32.totalorder %s2037_s24, %s2727_s9 }
  0x18   : > { %p2040_p0 = pnand %p2039_p13, %p2038_p12 }
  0x1a   : > { %p2041_p3 = pneg %p2040_p0 }
  0x1c   : > { %p2046_p7 = pnand %p2044_p5, %p2041_p3 }
  0x1e   : > { %2049 = shalt.err (!%p2046_p7)
}
  0x1f   : > { %s2050_s20 = scalar_lea.vmem %s2322_s18, 2048  ;;  %p2058_p2 = scmp.lt.s32.totalorder %s2322_s18, %s2322_s18 }
  0x20   : > { %p2051_p9 = scmp.ne.s32.totalorder %s2322_s18, %s2050_s20  ;;  %p2059_p12 = scmp.lt.s32.totalorder %s2050_s20, %s2050_s20 }
  0x22   : > { %p2053_p10 = pnand %p2051_p9, %p2039_p13  ;;  %p2060_p0 = por %p2059_p12, %p2058_p2 }
  0x24   : > { %p2054_p1 = pneg %p2053_p10 }
  0x26   : > { %p2061_p6 = pnand %p2060_p0, %p2054_p1 }
  0x28   : > { %2064 = shalt.err (!%p2061_p6)
}
  0x29   : > { %s2736_s25 = smov 128   ;;  %s2737_s15 = smov 8  }
  0x2a   : > { %1868 = dma.hbm_to_vmem [thread:$0]  (!%p2329_p11), %s2727_s9, 2048, %s2322_s18, [#allocation7], %s2736_s25, %s2736_s25, %s2737_s15  }
  0x2b   : > { %s2065_s17 = scalar_lea.hbm %s2729_s11, 2048 }
  0x2c   : > { %p2066_p1 = scmp.ne.s32.totalorder %s2729_s11, %s2065_s17  ;;  %p2072_p10 = scmp.lt.u32.totalorder %s2065_s17, %s2729_s11 }
  0x2e   : > { %p2068_p2 = pnand %p2066_p1, %p2039_p13 }
  0x30   : > { %p2069_p6 = pneg %p2068_p2 }
  0x32   : > { %p2074_p3 = pnand %p2072_p10, %p2069_p6 }
  0x34   : > { %2077 = shalt.err (!%p2074_p3)
}
  0x35   : > { %s2078_s18 = scalar_lea.vmem %s2333_s21, 2048  ;;  %p2086_p12 = scmp.lt.s32.totalorder %s2333_s21, %s2333_s21 }
  0x36   : > { %p2079_p5 = scmp.ne.s32.totalorder %s2333_s21, %s2078_s18  ;;  %p2087_p0 = scmp.lt.s32.totalorder %s2078_s18, %s2078_s18 }
  0x38   : > { %p2081_p7 = pnand %p2079_p5, %p2039_p13  ;;  %p2088_p1 = por %p2087_p0, %p2086_p12 }
  0x3a   : > { %p2082_p9 = pneg %p2081_p7 }
  0x3c   : > { %p2089_p2 = pnand %p2088_p1, %p2082_p9 }
  0x3e   : > { %2092 = shalt.err (!%p2089_p2)
}
  0x3f   : > { %s2199_s10 = smov 64   ;;  %s2200_s12 = smov 4  }
  0x40   : > { %1871 = dma.hbm_to_vmem [thread:$0]  (!%p2329_p11), %s2729_s11, 2048, %s2333_s21, [#allocation7], %s2199_s10, %s2199_s10, %s2200_s12  }
  0x41   : > { %s2391_s23 = sadd.s32 1, %s2193_s28   ;;  %s37_s30 = sadd.s32 1, %s2189_s27 }
  0x42   : > { %s34_s24 = ssub.s32 %s2193_s28, %s2391_s23  ;;  %p44_p6 = scmp.ne.s32.totalorder %s2189_s27, %s2185_s26 }
  0x43   : > { %p35_p13 = scmp.eq.s32.totalorder %s34_s24, 0  ;;  %p45_p10 = scmp.eq.s32.totalorder %s2193_s28, 0 }
  0x44   : > { %p2749_p5 = scmp.eq.s32.totalorder %s2299_s29, 1  ;;  %p1882_p9 = scmp.lt.s32.totalorder %s2193_s28, 2 }
  0x45   : > { %s2400_s17 = scalar_select %p35_p13, %s2189_s27, %s37_s30  }
  0x46   : > { %p46_p3 = por %p45_p10, %p44_p6  ;;  %p2404_p7 = por %p2749_p5, %p44_p6 }
  0x47   : > { %s408_s19 = sand.u32 1, %s2189_s27   ;;  %s1739_s21 = sshll.u32 %s2193_s28, 9 }
  0x48   : > { %s2750_s20 = scalar_select %p2404_p7, 1, 0 }
  0x49   : > { %s1675_s18 = sshll.u32 %s408_s19, 5  ;;  %s2414_s13 = scalar_lea.hbm %s2718_s0, %s1739_s21 }
  0x4a   : > { %s412_s22 = scalar_lea.vmem [#allocation3], %s1675_s18  ;;  %p2418_p11 = pnand %p1882_p9, %p46_p3 }
  0x4b   : > { %s419_s24 = sshll.u32 %s412_s22, 4  ;;  %s2422_s25 = scalar_lea.sflag [#allocation4], %s408_s19  ;;  %s2416_s24 = int_to_ptr.vmem [resolvable:$true] %s419_s24 }
  0x4c   : > { %s2093_s15 = scalar_lea.hbm %s2414_s13, 512  ;;  %p2095_p0 = pneg %p2418_p11 }
  0x4d   : > { %p2094_p12 = scmp.ne.s32.totalorder %s2414_s13, %s2093_s15  ;;  %s2098_s10 = scalar_lea.hbm %s2718_s0, 1024 }
  0x4e   : > { %p2099_p13 = scmp.lt.u32.totalorder %s2414_s13, %s2718_s0  ;;  %p2100_p6 = scmp.lt.u32.totalorder %s2098_s10, %s2093_s15 }
  0x4f   : > { %p2096_p1 = pnand %p2095_p0, %p2094_p12  ;;  %p2102_p3 = scmp.lt.u32.totalorder %s2093_s15, %s2414_s13 }
  0x50   : > { %p2101_p10 = por %p2100_p6, %p2099_p13 }
  0x51   : > { %p2097_p2 = pneg %p2096_p1 }
  0x52   : > { %p2103_p5 = por %p2102_p3, %p2101_p10 }
  0x54   : > { %p2104_p9 = pnand %p2103_p5, %p2097_p2 }
  0x56   : > { %2107 = shalt.err (!%p2104_p9)
}
  0x57   : > { %s2108_s19 = scalar_lea.vmem %s2416_s24, 512  ;;  %s2201_s18 = smov [#allocation3]  }
  0x58   : > { %p2109_p12 = scmp.ne.s32.totalorder %s2416_s24, %s2108_s19  ;;  %s2113_s21 = sshll.u32 %s2201_s18, 4  ;;  %s2114_s21 = int_to_ptr.vmem [resolvable:$false] %s2113_s21 }
  0x59   : > { %s2115_s12 = scalar_lea.vmem %s2114_s21, 1024  ;;  %p2116_p4 = scmp.lt.s32.totalorder %s2416_s24, %s2114_s21 }
  0x5a   : > { %p2111_p1 = pnand %p2109_p12, %p2095_p0  ;;  %p2117_p13 = scmp.lt.s32.totalorder %s2115_s12, %s2108_s19 }
  0x5c   : > { %p2112_p7 = pneg %p2111_p1  ;;  %p2118_p6 = por %p2117_p13, %p2116_p4 }
  0x5e   : > { %p2119_p10 = pnand %p2118_p6, %p2112_p7 }
  0x60   : > { %2122 = shalt.err (!%p2119_p10)
}
  0x61   : > { %s2752_s15 = smov 8   ;;  %s2753_s10 = smov 128  }
  0x62   : > { %1875 = dma.hbm_to_vmem [thread:$0]  (!%p2418_p11), %s2414_s13, 512, %s2416_s24, %s2422_s25, %s2753_s10, %s2753_s10, %s2752_s15  }
  0x63   : > { %431 = sbr.rel (%p2318_p8) target bundleno = 1697 (0x6a1), region = 72  ;;  %s2456_s22 = sand.u32 (!%p2318_p8), 1, %s2185_s26  }
  0x64   : > { %s1679_s19 = sshll.u32 (!%p2318_p8), %s2456_s22, 5  ;;  %s434_s18 = scalar_lea.sflag (!%p2318_p8), [#allocation4], %s2456_s22 }
  0x65   : > { %s437_s30 = scalar_lea.vmem (!%p2318_p8), [#allocation3], %s1679_s19  ;;  %p2754_p4 = scmp.ne.s32.totalorder (!%p2318_p8), %s2744_s14, 0 }
  0x6a   : > { %2168 = dma.done.wait (%p2754_p4), %s434_s18, 512  }
  0x6b   : > { %2170 = vsyncadd (%p2754_p4), %s434_s18, 4294966784  ;;  %p2755_p7 = scmp.eq.s32.totalorder %s2299_s29, 0 }
  0x6d   : > { %2172 = dma.done.wait (%p2755_p7), [#allocation7], 4096   ;;  %p2756_p8 = pmov %p2755_p7 }
  0x6e   : > { %v2470_v0 = vld [vmem:[%s437_s30] sm:$0xff]  ;;  %v2472_v1 = vld [vmem:[%s437_s30 + $0x10] sm:$0xff]  ;;  %v2474_v2 = vld [vmem:[%s437_s30 + $0x8] sm:$0xff]  ;;  %vm603_vm0 = vcmask 64512   ;;  %v2202_v22 = vmov 0   ;;  %vm610_vm1 = vcmask 1043456  }
  0x6f   : > { %2174 = vsyncadd (%p2756_p8), [#allocation7], 4294963200  ;;  %497 = vadd.xlane.f32.xlu0 %v2470_v0  ;;  %501 = vadd.xlane.f32.xlu1 %v2472_v1  ;;  %v2478_v3 = vld [vmem:[%s437_s30 + $0x18] sm:$0xff]  ;;  %v2489_v20 = vld [vmem:[%s2721_s3] sm:$0xff]   ;;  %vm2204_vm2 = vmmov 0   ;;  %vm685_vm3 = vcmask 261120  }
  0x70   : > { %1795 = vmatprep.mubr.msk.bf16.mxu0 %vm603_vm0, %v2489_v20  ;;  %v568_v21 = vld [vmem:[%s2722_s4 + $0x8] sm:$0xff]  ;;  %1930 = vset.pattern.permute.xlu1 %v2202_v22  ;;  %v567_v23 = vld [vmem:[%s2722_s4] sm:$0xff]  ;;  %v569_v24 = vld [vmem:[%s2722_s4 + $0x10] sm:$0xff]  ;;  %s2757_s24 = sld [smem:[#allocation15_spill]]  ;;  %s2758_s15 = sld [smem:[#allocation16_spill]] }
  0x71   : > { %1929 = vset.pattern.permute.xlu0 %v2202_v22  ;;  %v570_v25 = vld [vmem:[%s2722_s4 + $0x18] sm:$0xff]  ;;  %v571_v26 = vld [vmem:[%s2724_s6] sm:$0xff]  ;;  %v1932_v54 = vld [vmem:[%s2721_s3 + $0x8] sm:$0xff]   ;;  %s487_s10 = scalar_lea.vmem [#allocation9], %s1679_s19  ;;  %s1740_s30 = sshll.u32 %s2299_s29, 9 }
  0x72   : > { %v1683_v40 = vld [vmem:[%s2719_s1] ss:$0 sm:$0xff]  ;;  %s1578_s18 = sshll.u32 %s487_s10, 4  ;;  %s2759_s16 = sld [smem:[#allocation17_spill]]  ;;  %s2668_s18 = int_to_ptr.vmem [resolvable:$true] %s1578_s18 }
  0x73   : > { %499 = vadd.xlane.f32.xlu0 %v2474_v2  ;;  %503 = vadd.xlane.f32.xlu1 %v2478_v3  ;;  %v1684_v42 = vld [vmem:[%s2720_s2] ss:$0 sm:$0xff]  ;;  %s1565_s13 = scalar_lea.sflag [#allocation5], %s2456_s22  ;;  %p2760_p0 = scmp.ne.s32.totalorder %s2750_s20, 0 }
  0x74   : > { %s2205_s29 = smov [#allocation9]  }
  0x75   : > { %s2127_s21 = sshll.u32 %s2205_s29, 4  ;;  %s2128_s21 = int_to_ptr.vmem [resolvable:$false] %s2127_s21 }
  0x76   : > { %s2129_s12 = scalar_lea.vmem %s2128_s21, 1024  ;;  %p2130_p5 = scmp.lt.s32.totalorder %s2668_s18, %s2128_s21 }
  0x78   : > { %s2674_s25 = scalar_lea.hbm %s2759_s16, %s1740_s30 }
  0xfc   : > { %v498_v4 = vpop.xlane.xlu0 %497  ;;  %v502_v5 = vpop.xlane.xlu1 %501 }
  0xfd   : > { %v506_v6 = vmul.f32 0.0078125, %v498_v4  ;;  %v508_v7 = vmul.f32 0.0078125, %v502_v5 }
  0xff   : > { %v510_v8 = vsub.f32 %v2470_v0, %v506_v6  ;;  %v512_v9 = vsub.f32 %v2472_v1, %v508_v7  ;;  %v2203_v6 = vmov 0.0  }
 0x100   : > { %v500_v10 = vpop.xlane.xlu0 %499  ;;  %v504_v11 = vpop.xlane.xlu1 %503  ;;  %1799 = vmatprep.subr.bf16.mxu1 %v2203_v6  ;;  %1803 = vmatprep.mubr.msk.bf16.mxu1 %vm2204_vm2, %v2203_v6 }
 0x101   : > { %v507_v12 = vmul.f32 0.0078125, %v500_v10  ;;  %v514_v13 = vmul.f32 %v510_v8, %v510_v8  ;;  %v509_v14 = vmul.f32 0.0078125, %v504_v11  ;;  %v516_v17 = vmul.f32 %v512_v9, %v512_v9 }
 0x103   : > { %v511_v15 = vsub.f32 %v2474_v2, %v507_v12  ;;  %518 = vadd.xlane.f32.xlu0 %v514_v13  ;;  %v513_v16 = vsub.f32 %v2478_v3, %v509_v14 }
 0x105   : > { %v515_v18 = vmul.f32 %v511_v15, %v511_v15  ;;  %v517_v19 = vmul.f32 %v513_v16, %v513_v16 }
 0x107   : > { %522 = vadd.xlane.f32.xlu0 %v516_v17  ;;  %520 = vadd.xlane.f32.xlu1 %v515_v18 }
 0x10b   : > { %524 = vadd.xlane.f32.xlu1 %v517_v19 }
 0x11c   : > { %580 = vperm.xlu1 %1930, %v568_v21  }
 0x11d   : > { %575 = vperm.xlu0 %1929, %v567_v23  }
 0x120   : > { %585 = vperm.xlu1 %1930, %v569_v24  }
 0x124   : > { %590 = vperm.xlu1 %1930, %v570_v25  }
 0x128   : > { %732 = vperm.xlu1 %1930, %v571_v26  }
 0x190   : > { %v519_v27 = vpop.xlane.xlu0 %518 }
 0x191   : > { %v526_v28 = vmul.f32 0.0078125, %v519_v27 }
 0x193   : > { %v530_v29 = vadd.f32 1e-05, %v526_v28 }
 0x194   : > { %v521_v30 = vpop.xlane.xlu1 %520  ;;  %v523_v31 = vpop.xlane.xlu0 %522 }
 0x195   : > { %1973 = vrsqrt.f32 %v530_v29  ;;  %v527_v32 = vmul.f32 0.0078125, %v521_v30  ;;  %v528_v33 = vmul.f32 0.0078125, %v523_v31 }
 0x197   : > { %v531_v34 = vadd.f32 1e-05, %v527_v32  ;;  %v532_v35 = vadd.f32 1e-05, %v528_v33 }
 0x198   : > { %v525_v36 = vpop.xlane.xlu1 %524 }
 0x199   : > { %1975 = vrsqrt.f32 %v531_v34  ;;  %v529_v37 = vmul.f32 0.0078125, %v525_v36 }
 0x19a   : > { %1977 = vrsqrt.f32 %v532_v35 }
 0x19b   : > { %v533_v38 = vadd.f32 1e-05, %v529_v37 }
 0x19c   : > { %v2541_v7 = vpop.permute.xlu1 %580 }
 0x19d   : > { %1979 = vrsqrt.f32 %v533_v38 }
 0x19f   : > { %v1974_v39 = vpop.eup %1973 }
 0x1a0   : > { %v538_v41 = vmul.f32 %v1974_v39, %v510_v8  ;;  %v2543_v8 = vpop.permute.xlu1 %585 }
 0x1a2   : > { %v548_v43 = vmul.f32 %v1683_v40, %v538_v41 }
 0x1a3   : > { %v1976_v44 = vpop.eup %1975 }
 0x1a4   : > { %v1978_v45 = vpop.eup %1977  ;;  %v558_v46 = vadd.f32 %v1684_v42, %v548_v43  ;;  %v539_v47 = vmul.f32 %v1976_v44, %v511_v15  ;;  %v2548_v13 = vpop.permute.xlu1 %590 }
 0x1a5   : > { %v540_v48 = vmul.f32 %v1978_v45, %v512_v9  ;;  %v2545_v9 = vpop.permute.xlu0 %575 }
 0x1a6   : > { %v572_v49 = vpack.c.bf16 %v558_v46, %v558_v46  ;;  %v549_v50 = vmul.f32 %v1683_v40, %v539_v47 }
 0x1a7   : > { %v1980_v51 = vpop.eup %1979  ;;  %v550_v52 = vmul.f32 %v1683_v40, %v540_v48 }
 0x1a8   : > { %1849 = vmatprep.subr.msk.bf16.mxu0 %vm610_vm1, %v572_v49  ;;  %v612_v53 = vsel %vm610_vm1, %v572_v49, 0  ;;  %v559_v55 = vadd.f32 %v1684_v42, %v549_v50  ;;  %v541_v56 = vmul.f32 %v1980_v51, %v513_v16 }
 0x1a9   : > { %1794 = vmatpush3.bf16.msra.mxu0 %v612_v53  ;;  %v560_v57 = vadd.f32 %v1684_v42, %v550_v52 }
 0x1aa   : > { %v737_v58 = vpack.c.bf16 %v559_v55, %v559_v55  ;;  %v551_v61 = vmul.f32 %v1683_v40, %v541_v56 }
 0x1ab   : > { %v855_v60 = vpack.c.bf16 %v560_v57, %v560_v57 }
 0x1ac   : > { %1796 = vmatmul.mubr.msk.bf16.vlgmr.msra.gmra.mrb[0].mxu0 %vm603_vm0, %v1932_v54  ;;  %1850 = vmatprep.subr.msk.bf16.mxu0 %vm610_vm1, %v737_v58  ;;  %v739_v59 = vsel %vm610_vm1, %v737_v58, 0  ;;  %v561_v62 = vadd.f32 %v1684_v42, %v551_v61 }
 0x1ad   : > { %1808 = vmatpush3.bf16.msra.mxu0 %v739_v59  ;;  %1809 = vmatprep.mubr.msk.bf16.mxu0 %vm603_vm0, %v2489_v20  ;;  %v857_v63 = vsel %vm610_vm1, %v855_v60, 0 }
 0x1ae   : > { %1851 = vmatprep.subr.msk.bf16.mxu0 %vm610_vm1, %v855_v60  ;;  %v973_v4 = vpack.c.bf16 %v561_v62, %v561_v62 }
 0x1b0   : > { %v975_v5 = vsel %vm610_vm1, %v973_v4, 0 }
 0x1b4   : > { %1810 = vmatmul.mubr.msk.bf16.vlgmr.msra.gmra.mrb[4].mxu0 %vm603_vm0, %v1932_v54 }
 0x1b5   : > { %1822 = vmatpush3.bf16.msra.mxu0 %v857_v63  ;;  %1823 = vmatprep.mubr.msk.bf16.mxu0 %vm603_vm0, %v2489_v20 }
 0x1b6   : > { %1852 = vmatprep.subr.msk.bf16.mxu0 %vm610_vm1, %v973_v4 }
 0x1bc   : > { %1824 = vmatmul.mubr.msk.bf16.vlgmr.msra.gmra.mrb[8].mxu0 %vm603_vm0, %v1932_v54 }
 0x1bd   : > { %1836 = vmatpush3.bf16.msra.mxu0 %v975_v5  ;;  %1837 = vmatprep.mubr.msk.bf16.mxu0 %vm603_vm0, %v2489_v20 }
 0x1c4   : > { %1838 = vmatmul.mubr.msk.bf16.vlgmr.msra.gmra.mrb[12].mxu0 %vm603_vm0, %v1932_v54 }
 0x1c5   : > { %1303 = vmatprep.mubr.bf16.mxu0 %v2202_v22 }
 0x27f   : > { %v1797_v10 = vpop.f32.mrb[0].mxu0 }
 0x280   : > { %v657_v11 = vadd.f32 %v1797_v10, %v2543_v8  ;;  %v648_v12 = vpop.f32.mrb[1].mxu0 }
 0x281   : > { %v649_v14 = vadd.f32 %v648_v12, %v2545_v9  ;;  %v1798_v15 = vpop.f32.mrb[2].mxu0 }
 0x282   : > { %v669_v16 = vmul.f32 0.70710677, %v657_v11  ;;  %v660_v17 = vadd.f32 %v1798_v15, %v2548_v13  ;;  %v651_v18 = vpop.f32.mrb[3].mxu0  ;;  %v665_v40 = vmul.f32 0.5, %v657_v11 }
 0x283   : > { %v667_v19 = vmul.f32 0.70710677, %v649_v14  ;;  %v652_v20 = vadd.f32 %v651_v18, %v2541_v7  ;;  %v663_v53 = vmul.f32 0.5, %v649_v14 }
 0x284   : > { %1981 = verf.f32 %v669_v16  ;;  %v670_v21 = vmul.f32 0.70710677, %v660_v17  ;;  %v666_v45 = vmul.f32 0.5, %v660_v17 }
 0x285   : > { %v668_v23 = vmul.f32 0.70710677, %v652_v20  ;;  %1983 = verf.f32 %v667_v19  ;;  %v664_v56 = vmul.f32 0.5, %v652_v20 }
 0x286   : > { %1985 = verf.f32 %v670_v21 }
 0x287   : > { %1987 = verf.f32 %v668_v23  ;;  %v1811_v24 = vpop.f32.mrb[4].mxu0 }
 0x288   : > { %v784_v25 = vadd.f32 %v1811_v24, %v2543_v8  ;;  %v775_v26 = vpop.f32.mrb[5].mxu0 }
 0x289   : > { %v776_v27 = vadd.f32 %v775_v26, %v2545_v9  ;;  %v1812_v28 = vpop.f32.mrb[6].mxu0 }
 0x28a   : > { %v796_v29 = vmul.f32 0.70710677, %v784_v25  ;;  %v787_v30 = vadd.f32 %v1812_v28, %v2548_v13  ;;  %v778_v31 = vpop.f32.mrb[7].mxu0  ;;  %v792_v20 = vmul.f32 0.5, %v784_v25 }
 0x28b   : > { %v794_v32 = vmul.f32 0.70710677, %v776_v27  ;;  %v779_v33 = vadd.f32 %v778_v31, %v2541_v7  ;;  %v790_v28 = vmul.f32 0.5, %v776_v27 }
 0x28c   : > { %1989 = verf.f32 %v796_v29  ;;  %v797_v34 = vmul.f32 0.70710677, %v787_v30  ;;  %v793_v21 = vmul.f32 0.5, %v787_v30 }
 0x28d   : > { %1991 = verf.f32 %v794_v32  ;;  %v795_v35 = vmul.f32 0.70710677, %v779_v33  ;;  %v791_v29 = vmul.f32 0.5, %v779_v33  ;;  %v566_v33 = vld [vmem:[%s2723_s5] sm:$0xf] }
 0x28e   : > { %v1982_v36 = vpop.eup %1981  ;;  %1993 = verf.f32 %v797_v34 }
 0x28f   : > { %v1984_v37 = vpop.eup %1983  ;;  %1995 = verf.f32 %v795_v35  ;;  %v1825_v38 = vpop.f32.mrb[8].mxu0  ;;  %v677_v41 = vadd.f32 1.0, %v1982_v36 }
 0x290   : > { %v1986_v39 = vpop.eup %1985  ;;  %v2558_v42 = vadd.f32 %v1825_v38, %v2543_v8  ;;  %v893_v43 = vpop.f32.mrb[9].mxu0  ;;  %v675_v49 = vadd.f32 1.0, %v1984_v37 }
 0x291   : > { %v1988_v44 = vpop.eup %1987  ;;  %v678_v46 = vadd.f32 1.0, %v1986_v39  ;;  %v2561_v47 = vadd.f32 %v893_v43, %v2545_v9  ;;  %v1826_v48 = vpop.f32.mrb[10].mxu0  ;;  %v681_v59 = vmul.f32 %v677_v41, %v665_v40 }
 0x292   : > { %v914_v50 = vmul.f32 0.70710677, %v2558_v42  ;;  %v2565_v51 = vadd.f32 %v1826_v48, %v2548_v13  ;;  %v896_v52 = vpop.f32.mrb[11].mxu0  ;;  %v676_v54 = vadd.f32 1.0, %v1988_v44  ;;  %v679_v62 = vmul.f32 %v675_v49, %v663_v53 }
 0x293   : > { %v682_v55 = vmul.f32 %v678_v46, %v666_v45  ;;  %v912_v57 = vmul.f32 0.70710677, %v2561_v47  ;;  %v2569_v58 = vadd.f32 %v896_v52, %v2541_v7  ;;  %v910_v46 = vmul.f32 0.5, %v2558_v42 }
 0x294   : > { %1997 = verf.f32 %v914_v50  ;;  %v915_v60 = vmul.f32 0.70710677, %v2565_v51  ;;  %v680_v63 = vmul.f32 %v676_v54, %v664_v56  ;;  %v911_v48 = vmul.f32 0.5, %v2565_v51 }
 0x295   : > { %1999 = verf.f32 %v912_v57  ;;  %v913_v61 = vmul.f32 0.70710677, %v2569_v58  ;;  %v684_v5 = vpack.c.bf16 %v682_v55, %v681_v59  ;;  %v908_v50 = vmul.f32 0.5, %v2561_v47 }
 0x296   : > { %v1990_v4 = vpop.eup %1989  ;;  %2001 = verf.f32 %v915_v60  ;;  %v683_v14 = vpack.c.bf16 %v680_v63, %v679_v62  ;;  %v909_v52 = vmul.f32 0.5, %v2569_v58 }
 0x297   : > { %v1992_v10 = vpop.eup %1991  ;;  %v804_v11 = vadd.f32 1.0, %v1990_v4  ;;  %2003 = verf.f32 %v913_v61  ;;  %v1839_v12 = vpop.f32.mrb[12].mxu0 }
 0x298   : > { %v1994_v15 = vpop.eup %1993  ;;  %v802_v16 = vadd.f32 1.0, %v1992_v10  ;;  %v2574_v17 = vadd.f32 %v1839_v12, %v2543_v8  ;;  %v1011_v18 = vpop.f32.mrb[13].mxu0  ;;  %1800 = vmatpush3.bf16.msra.mxu1 %v683_v14 }
 0x299   : > { %v1996_v19 = vpop.eup %1995  ;;  %v805_v23 = vadd.f32 1.0, %v1994_v15  ;;  %v2577_v24 = vadd.f32 %v1011_v18, %v2545_v9  ;;  %v1840_v26 = vpop.f32.mrb[14].mxu0  ;;  %1801 = vmatprep.subr.bf16.mxu1 %v2203_v6  ;;  %v808_v8 = vmul.f32 %v804_v11, %v792_v20 }
 0x29a   : > { %v803_v31 = vadd.f32 1.0, %v1996_v19  ;;  %v1032_v32 = vmul.f32 0.70710677, %v2574_v17  ;;  %v1014_v34 = vpop.f32.mrb[15].mxu0  ;;  %v1023_v25 = vadd.f32 %v1840_v26, %v2548_v13  ;;  %v806_v30 = vmul.f32 %v802_v16, %v790_v28 }
 0x29b   : > { %v809_v35 = vmul.f32 %v805_v23, %v793_v21  ;;  %v1030_v36 = vmul.f32 0.70710677, %v2577_v24  ;;  %v1015_v9 = vadd.f32 %v1014_v34, %v2541_v7  ;;  %v1028_v63 = vmul.f32 0.5, %v2574_v17 }
 0x29c   : > { %v807_v37 = vmul.f32 %v803_v31, %v791_v29  ;;  %2005 = verf.f32 %v1032_v32  ;;  %v1033_v27 = vmul.f32 0.70710677, %v1023_v25  ;;  %1802 = vmatpush3.bf16.msra.mxu1 %v684_v5  ;;  %v1029_v4 = vmul.f32 0.5, %v1023_v25 }
 0x29d   : > { %v811_v38 = vpack.c.bf16 %v809_v35, %v808_v8  ;;  %2007 = verf.f32 %v1030_v36  ;;  %v1031_v41 = vmul.f32 0.70710677, %v1015_v9  ;;  %1813 = vmatprep.subr.bf16.mxu1 %v2203_v6  ;;  %v1026_v10 = vmul.f32 0.5, %v2577_v24  ;;  %v733_v24 = vpop.permute.xlu1 %732 }
 0x29e   : > { %v1998_v39 = vpop.eup %1997  ;;  %v810_v40 = vpack.c.bf16 %v807_v37, %v806_v30  ;;  %2009 = verf.f32 %v1033_v27  ;;  %v1027_v11 = vmul.f32 0.5, %v1015_v9 }
 0x29f   : > { %v2000_v13 = vpop.eup %1999  ;;  %v922_v43 = vadd.f32 1.0, %v1998_v39  ;;  %2011 = verf.f32 %v1031_v41  ;;  %1804 = vmatmul.mubr.msk.bf16.vlgmr.msra.gmra.mrb[0].mxu1 %vm685_vm3, %v566_v33  ;;  %v1933_v41 = vld [vmem:[#allocation6] ss:$8 sps:$4 sm:$0xff]  }
 0x2a0   : > { %v2002_v44 = vpop.eup %2001  ;;  %v920_v45 = vadd.f32 1.0, %v2000_v13  ;;  %1814 = vmatpush3.bf16.msra.mxu1 %v810_v40  ;;  %1817 = vmatprep.mubr.msk.bf16.mxu1 %vm2204_vm2, %v2203_v6  ;;  %v1935_v13 = vld [vmem:[#allocation6 + $0x4] ss:$8 sps:$4 sm:$0xff]  }
 0x2a1   : > { %v2004_v7 = vpop.eup %2003  ;;  %v923_v49 = vadd.f32 1.0, %v2002_v44  ;;  %1815 = vmatprep.subr.bf16.mxu1 %v2203_v6  ;;  %v926_v54 = vmul.f32 %v922_v43, %v910_v46  ;;  %1271 = vmatprep.subr.bf16.mxu0 %v1935_v13 }
 0x2a2   : > { %v921_v53 = vadd.f32 1.0, %v2004_v7  ;;  %v924_v56 = vmul.f32 %v920_v45, %v908_v50  ;;  %1272 = vmatpush1.bf16.msra.mxu0 %v1933_v41 }
 0x2a3   : > { %v927_v55 = vmul.f32 %v923_v49, %v911_v48 }
 0x2a4   : > { %v925_v57 = vmul.f32 %v921_v53, %v909_v52  ;;  %1816 = vmatpush3.bf16.msra.mxu1 %v811_v38 }
 0x2a5   : > { %v929_v59 = vpack.c.bf16 %v927_v55, %v926_v54  ;;  %1827 = vmatprep.subr.bf16.mxu1 %v2203_v6  ;;  %v1938_v54 = vld [vmem:[#allocation6 + $0x14] ss:$8 sps:$4 sm:$0xff]  }
 0x2a6   : > { %v2006_v42 = vpop.eup %2005  ;;  %v928_v51 = vpack.c.bf16 %v925_v57, %v924_v56  ;;  %v1936_v56 = vld [vmem:[#allocation6 + $0x10] ss:$8 sps:$4 sm:$0xff]   ;;  %1273 = vmatprep.subr.bf16.mxu0 %v1938_v54  ;;  %v1966_v54 = vld [vmem:[#allocation8 + $0x20] sm:$0xff]  }
 0x2a7   : > { %v2008_v60 = vpop.eup %2007  ;;  %v1040_v61 = vadd.f32 1.0, %v2006_v42  ;;  %1818 = vmatmul.mubr.msk.bf16.vlgmr.msra.gmra.mrb[4].mxu1 %vm685_vm3, %v566_v33  ;;  %1274 = vmatpush1.bf16.msra.mxu0 %v1936_v56  ;;  %v1941_v42 = vld [vmem:[#allocation6 + $0x24] ss:$8 sps:$4 sm:$0xff]   ;;  %v1969_v56 = vld [vmem:[#allocation8 + $0x70] sm:$0xff]  }
 0x2a8   : > { %v2010_v47 = vpop.eup %2009  ;;  %v1038_v62 = vadd.f32 1.0, %v2008_v60  ;;  %1828 = vmatpush3.bf16.msra.mxu1 %v928_v51  ;;  %1831 = vmatprep.mubr.msk.bf16.mxu1 %vm2204_vm2, %v2203_v6  ;;  %v1939_v51 = vld [vmem:[#allocation6 + $0x20] ss:$8 sps:$4 sm:$0xff]  }
 0x2a9   : > { %v2012_v58 = vpop.eup %2011  ;;  %v1041_v5 = vadd.f32 1.0, %v2010_v47  ;;  %1829 = vmatprep.subr.bf16.mxu1 %v2203_v6  ;;  %v1044_v14 = vmul.f32 %v1040_v61, %v1028_v63  ;;  %1275 = vmatprep.subr.bf16.mxu0 %v1941_v42  ;;  %v1944_v61 = vld [vmem:[#allocation6 + $0x34] ss:$8 sps:$4 sm:$0xff]   ;;  %v1942_v47 = vld [vmem:[#allocation6 + $0x30] ss:$8 sps:$4 sm:$0xff]  }
 0x2aa   : > { %v1039_v12 = vadd.f32 1.0, %v2012_v58  ;;  %v1042_v16 = vmul.f32 %v1038_v62, %v1026_v10  ;;  %v1947_v62 = vld [vmem:[#allocation6 + $0x44] ss:$8 sps:$4 sm:$0xff]   ;;  %v1945_v58 = vld [vmem:[#allocation6 + $0x40] ss:$8 sps:$4 sm:$0xff]   ;;  %v1972_v42 = vld [vmem:[#allocation8 + $0x38] sm:$0xff]  }
 0x2ab   : > { %v1045_v15 = vmul.f32 %v1041_v5, %v1029_v4  ;;  %1276 = vmatpush1.bf16.msra.mxu0 %v1939_v51  ;;  %v1950_v63 = vld [vmem:[#allocation6 + $0x54] ss:$8 sps:$4 sm:$0xff]   ;;  %v1948_v4 = vld [vmem:[#allocation6 + $0x50] ss:$8 sps:$4 sm:$0xff]   ;;  %v1953_v5 = vld [vmem:[#allocation6 + $0x64] ss:$8 sps:$4 sm:$0xff]   ;;  %v1181_v51 = vlaneseq }
 0x2ac   : > { %v1043_v18 = vmul.f32 %v1039_v12, %v1027_v11  ;;  %1830 = vmatpush3.bf16.msra.mxu1 %v929_v59  ;;  %1277 = vmatprep.subr.bf16.mxu0 %v1944_v61  ;;  %v1951_v10 = vld [vmem:[#allocation6 + $0x60] ss:$8 sps:$4 sm:$0xff]   ;;  %v1956_v11 = vld [vmem:[#allocation6 + $0x74] ss:$8 sps:$4 sm:$0xff]   ;;  %v1954_v12 = vld [vmem:[#allocation6 + $0x70] ss:$8 sps:$4 sm:$0xff]  }
 0x2ad   : > { %v1047_v19 = vpack.c.bf16 %v1045_v15, %v1044_v14  ;;  %1841 = vmatprep.subr.bf16.mxu1 %v2203_v6  ;;  %v1957_v14 = vld [vmem:[#allocation8 + $0x40] sm:$0xff]  }
 0x2ae   : > { %v1046_v20 = vpack.c.bf16 %v1043_v18, %v1042_v16  ;;  %v1958_v15 = vld [vmem:[#allocation8] sm:$0xff]   ;;  %v1959_v16 = vld [vmem:[#allocation8 + $0x48] sm:$0xff]  }
 0x2af   : > { %1832 = vmatmul.mubr.msk.bf16.vlgmr.msra.gmra.mrb[8].mxu1 %vm685_vm3, %v566_v33  ;;  %1278 = vmatpush1.bf16.msra.mxu0 %v1942_v47  ;;  %v1960_v18 = vld [vmem:[#allocation8 + $0x8] sm:$0xff]   ;;  %v1179_v47 = vld [vmem:[%s2757_s24] sm:$0x3]  ;;  %s2123_s24 = scalar_lea.vmem %s2668_s18, 512 }
 0x2b0   : > { %1842 = vmatpush3.bf16.msra.mxu1 %v1046_v20  ;;  %1845 = vmatprep.mubr.msk.bf16.mxu1 %vm2204_vm2, %v2203_v6  ;;  %p2124_p11 = scmp.ne.s32.totalorder %s2668_s18, %s2123_s24  ;;  %p2131_p9 = scmp.lt.s32.totalorder %s2129_s12, %s2123_s24 }
 0x2b1   : > { %1843 = vmatprep.subr.bf16.mxu1 %v2203_v6  ;;  %1279 = vmatprep.subr.bf16.mxu0 %v1947_v62 }
 0x2b2   : > { %p2125_p2 = pnand %p2124_p11, %p2760_p0  ;;  %p2132_p12 = por %p2131_p9, %p2130_p5 }
 0x2b3   : > { %1280 = vmatpush1.bf16.msra.mxu0 %v1945_v58 }
 0x2b4   : > { %1844 = vmatpush3.bf16.msra.mxu1 %v1047_v19  ;;  %1281 = vmatprep.subr.bf16.mxu0 %v1950_v63  ;;  %p2126_p3 = pneg %p2125_p2 }
 0x2b5   : > { %1765 = vmatprep.subr.bf16.mxu1 %v1957_v14 }
 0x2b6   : > { %p2133_p1 = pnand %p2132_p12, %p2126_p3 }
 0x2b7   : > { %1846 = vmatmul.mubr.msk.bf16.vlgmr.msra.gmra.mrb[12].mxu1 %vm685_vm3, %v566_v33  ;;  %1282 = vmatpush1.bf16.msra.mxu0 %v1948_v4 }
 0x2b8   : > { %1283 = vmatprep.subr.bf16.mxu0 %v1953_v5  ;;  %1766 = vmatpush3.bf16.msra.mxu1 %v1958_v15 }
 0x2b9   : > { %1767 = vmatprep.subr.bf16.mxu1 %v1959_v16 }
 0x2bb   : > { %1284 = vmatpush1.bf16.msra.mxu0 %v1951_v10 }
 0x2bc   : > { %1285 = vmatprep.subr.bf16.mxu0 %v1956_v11  ;;  %1768 = vmatpush3.bf16.msra.mxu1 %v1960_v18 }
 0x2bf   : > { %1286 = vmatpush1.bf16.msra.mxu0 %v1954_v12 }
 0x372   : > { %v723_v17 = vpop.f32.mrb[0].mxu1 }
 0x373   : > { %v729_v21 = vadd.f32 %v723_v17, %v2470_v0  ;;  %v1805_v23 = vpop.f32.mrb[1].mxu1 }
 0x374   : > { %v726_v26 = vpop.f32.mrb[2].mxu1 }
 0x375   : > { %v2610_v28 = vadd.f32 %v733_v24, %v729_v21  ;;  %v1806_v29 = vpop.f32.mrb[3].mxu1 }
 0x377   : > { %1097 = vadd.xlane.f32.xlu1 %v2610_v28 }
 0x37a   : > { %v846_v31 = vpop.f32.mrb[4].mxu1 }
 0x37b   : > { %v852_v32 = vadd.f32 %v846_v31, %v2474_v2  ;;  %v1819_v34 = vpop.f32.mrb[5].mxu1 }
 0x37c   : > { %v849_v8 = vpop.f32.mrb[6].mxu1 }
 0x37d   : > { %v2614_v6 = vadd.f32 %v852_v32, %v733_v24  ;;  %v1820_v35 = vpop.f32.mrb[7].mxu1  ;;  %v1699_v8 = vld [vmem:[%s2725_s7] ss:$0 sm:$0xff] }
 0x37f   : > { %1099 = vadd.xlane.f32.xlu0 %v2614_v6 }
 0x382   : > { %v964_v36 = vpop.f32.mrb[8].mxu1 }
 0x383   : > { %v970_v0 = vadd.f32 %v964_v36, %v2472_v1  ;;  %v1833_v25 = vpop.f32.mrb[9].mxu1 }
 0x384   : > { %v967_v30 = vpop.f32.mrb[10].mxu1 }
 0x385   : > { %v2618_v37 = vadd.f32 %v970_v0, %v733_v24  ;;  %v1834_v9 = vpop.f32.mrb[11].mxu1 }
 0x386   : > { %v1700_v9 = vld [vmem:[%s2726_s8] ss:$0 sm:$0xff] }
 0x387   : > { %1101 = vadd.xlane.f32.xlu1 %v2618_v37 }
 0x38a   : > { %v1082_v38 = vpop.f32.mrb[12].mxu1 }
 0x38b   : > { %v1088_v2 = vadd.f32 %v1082_v38, %v2478_v3  ;;  %v1847_v27 = vpop.f32.mrb[13].mxu1 }
 0x38c   : > { %v1085_v33 = vpop.f32.mrb[14].mxu1 }
 0x38d   : > { %v2622_v39 = vadd.f32 %v1088_v2, %v733_v24  ;;  %v1848_v40 = vpop.f32.mrb[15].mxu1 }
 0x38f   : > { %1103 = vadd.xlane.f32.xlu1 %v2622_v39 }
 0x404   : > { %v1098_v1 = vpop.xlane.xlu1 %1097 }
 0x405   : > { %v1105_v43 = vmul.f32 0.0078125, %v1098_v1 }
 0x407   : > { %v2626_v44 = vsub.f32 %v2610_v28, %v1105_v43 }
 0x409   : > { %v1113_v45 = vmul.f32 %v2626_v44, %v2626_v44 }
 0x40b   : > { %1117 = vadd.xlane.f32.xlu1 %v1113_v45 }
 0x40c   : > { %v1100_v3 = vpop.xlane.xlu0 %1099 }
 0x40d   : > { %v1106_v7 = vmul.f32 0.0078125, %v1100_v3 }
 0x40f   : > { %v2631_v46 = vsub.f32 %v2614_v6, %v1106_v7 }
 0x411   : > { %v1114_v48 = vmul.f32 %v2631_v46, %v2631_v46 }
 0x413   : > { %1119 = vadd.xlane.f32.xlu0 %v1114_v48  ;;  %v1961_v48 = vld [vmem:[#allocation8 + $0x50] sm:$0xff]  }
 0x414   : > { %v1102_v49 = vpop.xlane.xlu1 %1101  ;;  %1769 = vmatprep.subr.bf16.mxu1 %v1961_v48 }
 0x415   : > { %v1107_v50 = vmul.f32 0.0078125, %v1102_v49  ;;  %v1962_v49 = vld [vmem:[#allocation8 + $0x10] sm:$0xff]  }
 0x416   : > { %1770 = vmatpush3.bf16.msra.mxu1 %v1962_v49 }
 0x417   : > { %v2636_v52 = vsub.f32 %v2618_v37, %v1107_v50  ;;  %v1963_v50 = vld [vmem:[#allocation8 + $0x58] sm:$0xff]  }
 0x418   : > { %1771 = vmatprep.subr.bf16.mxu1 %v1963_v50 }
 0x419   : > { %v1115_v53 = vmul.f32 %v2636_v52, %v2636_v52 }
 0x41b   : > { %1121 = vadd.xlane.f32.xlu1 %v1115_v53  ;;  %v1964_v53 = vld [vmem:[#allocation8 + $0x18] sm:$0xff]  }
 0x41c   : > { %v1104_v55 = vpop.xlane.xlu1 %1103  ;;  %1772 = vmatpush3.bf16.msra.mxu1 %v1964_v53 }
 0x41d   : > { %v1108_v57 = vmul.f32 0.0078125, %v1104_v55  ;;  %v1968_v55 = vld [vmem:[#allocation8 + $0x28] sm:$0xff]  }
 0x41f   : > { %v2641_v59 = vsub.f32 %v2622_v39, %v1108_v57  ;;  %v1970_v57 = vld [vmem:[#allocation8 + $0x30] sm:$0xff]  }
 0x421   : > { %v1116_v60 = vmul.f32 %v2641_v59, %v2641_v59 }
 0x423   : > { %1123 = vadd.xlane.f32.xlu0 %v1116_v60  ;;  %v1182_v60 = vshrl.u32 %v1181_v51, 7 }
 0x425   : > { %v1183_v61 = vsub.s32 0, %v1182_v60  ;;  %v1187_v62 = vsub.s32 1, %v1182_v60 }
 0x427   : > { %v1184_v58 = vrot.slane %v1179_v47, %v1183_v61  ;;  %v1188_v63 = vrot.slane %v1179_v47, %v1187_v62 }
 0x498   : > { %v1118_v19 = vpop.xlane.xlu1 %1117 }
 0x499   : > { %v1125_v20 = vmul.f32 0.0078125, %v1118_v19 }
 0x49b   : > { %v1129_v17 = vadd.f32 1e-05, %v1125_v20 }
 0x49d   : > { %2013 = vrsqrt.f32 %v1129_v17 }
 0x4a0   : > { %v1120_v21 = vpop.xlane.xlu0 %1119 }
 0x4a1   : > { %v1126_v23 = vmul.f32 0.0078125, %v1120_v21 }
 0x4a3   : > { %v1130_v24 = vadd.f32 1e-05, %v1126_v23 }
 0x4a5   : > { %2015 = vrsqrt.f32 %v1130_v24 }
 0x4a7   : > { %v2014_v29 = vpop.eup %2013 }
 0x4a8   : > { %v1122_v26 = vpop.xlane.xlu1 %1121  ;;  %v1137_v34 = vmul.f32 %v2014_v29, %v2626_v44 }
 0x4a9   : > { %v1127_v31 = vmul.f32 0.0078125, %v1122_v26 }
 0x4aa   : > { %v1147_v25 = vmul.f32 %v1699_v8, %v1137_v34 }
 0x4ab   : > { %v1131_v32 = vadd.f32 1e-05, %v1127_v31 }
 0x4ac   : > { %v1157_v27 = vadd.f32 %v1700_v9, %v1147_v25 }
 0x4ad   : > { %2017 = vrsqrt.f32 %v1131_v32 }
 0x4af   : > { %v2016_v35 = vpop.eup %2015 }
 0x4b0   : > { %v1138_v36 = vmul.f32 %v2016_v35, %v2631_v46  ;;  %v1124_v0 = vpop.xlane.xlu0 %1123 }
 0x4b1   : > { %v1128_v30 = vmul.f32 0.0078125, %v1124_v0 }
 0x4b2   : > { %v1148_v38 = vmul.f32 %v1699_v8, %v1138_v36 }
 0x4b3   : > { %v1132_v2 = vadd.f32 1e-05, %v1128_v30 }
 0x4b4   : > { %v1158_v33 = vadd.f32 %v1700_v9, %v1148_v38 }
 0x4b5   : > { %2019 = vrsqrt.f32 %v1132_v2 }
 0x4b6   : > { %v1161_v40 = vpack.c.bf16 %v1158_v33, %v1157_v27 }
 0x4b7   : > { %v2018_v41 = vpop.eup %2017 }
 0x4b8   : > { %1304 = vmatmul.mubr.bf16.vlgmr.msra.gmra.mrb[16].mxu0 %v1161_v40  ;;  %v1139_v13 = vmul.f32 %v2018_v41, %v2636_v52  ;;  %v1967_v52 = vld [vmem:[#allocation8 + $0x68] sm:$0xff]  }
 0x4b9   : > { %1313 = vmatprep.mubr.bf16.mxu0 %v2202_v22  ;;  %v1965_v22 = vld [vmem:[#allocation8 + $0x60] sm:$0xff]  }
 0x4ba   : > { %v1149_v44 = vmul.f32 %v1699_v8, %v1139_v13  ;;  %1773 = vmatprep.subr.bf16.mxu1 %v1965_v22 }
 0x4bb   : > { %1774 = vmatpush3.bf16.msra.mxu1 %v1966_v54 }
 0x4bc   : > { %v1159_v3 = vadd.f32 %v1700_v9, %v1149_v44  ;;  %1775 = vmatprep.subr.bf16.mxu1 %v1967_v52 }
 0x4bf   : > { %v2020_v1 = vpop.eup %2019  ;;  %1776 = vmatpush3.bf16.msra.mxu1 %v1968_v55 }
 0x4c0   : > { %v1140_v43 = vmul.f32 %v2020_v1, %v2641_v59  ;;  %1777 = vmatprep.subr.bf16.mxu1 %v1969_v56  ;;  %v1971_v59 = vld [vmem:[#allocation8 + $0x78] sm:$0xff]  }
 0x4c2   : > { %v1150_v45 = vmul.f32 %v1699_v8, %v1140_v43 }
 0x4c3   : > { %1778 = vmatpush3.bf16.msra.mxu1 %v1970_v57 }
 0x4c4   : > { %v1160_v7 = vadd.f32 %v1700_v9, %v1150_v45  ;;  %1779 = vmatprep.subr.bf16.mxu1 %v1971_v59 }
 0x4c6   : > { %v1162_v46 = vpack.c.bf16 %v1160_v7, %v1159_v3 }
 0x4c7   : > { %1780 = vmatpush3.bf16.msra.mxu1 %v1972_v42 }
 0x4c8   : > { %1314 = vmatmul.mubr.bf16.gmra.mrb[20].mxu0 %v1162_v46 }
 0x58b   : > { %v1305_v4 = vpop.f32.mrb[16].mxu0 }
 0x58c   : > { %v1306_v5 = vadd.f32 %v1305_v4, %v1184_v58  ;;  %v1307_v10 = vpop.f32.mrb[17].mxu0 }
 0x58d   : > { %v1308_v11 = vadd.f32 %v1307_v10, %v1188_v63  ;;  %v1309_v12 = vpop.f32.mrb[18].mxu0 }
 0x58e   : > { %v1332_v14 = vmul.f32 0.70710677, %v1306_v5  ;;  %v1310_v15 = vadd.f32 %v1309_v12, %v1184_v58  ;;  %v1311_v16 = vpop.f32.mrb[19].mxu0  ;;  %v1324_v35 = vmul.f32 0.5, %v1306_v5  ;;  %v1733_v12 = vld [vmem:[%s2758_s15] ss:$0 sm:$0xff] }
 0x58f   : > { %v1333_v18 = vmul.f32 0.70710677, %v1308_v11  ;;  %v1312_v19 = vadd.f32 %v1311_v16, %v1188_v63  ;;  %v1325_v9 = vmul.f32 0.5, %v1308_v11 }
 0x590   : > { %2021 = verf.f32 %v1332_v14  ;;  %v1334_v20 = vmul.f32 0.70710677, %v1310_v15  ;;  %v1326_v36 = vmul.f32 0.5, %v1310_v15 }
 0x591   : > { %2023 = verf.f32 %v1333_v18  ;;  %v1335_v17 = vmul.f32 0.70710677, %v1312_v19  ;;  %v1327_v38 = vmul.f32 0.5, %v1312_v19 }
 0x592   : > { %2025 = verf.f32 %v1334_v20 }
 0x593   : > { %2027 = verf.f32 %v1335_v17 }
 0x59a   : > { %v2022_v21 = vpop.eup %2021 }
 0x59b   : > { %v2024_v23 = vpop.eup %2023  ;;  %v1348_v24 = vadd.f32 1.0, %v2022_v21  ;;  %v1315_v26 = vpop.f32.mrb[20].mxu0 }
 0x59c   : > { %v2026_v29 = vpop.eup %2025  ;;  %v1349_v31 = vadd.f32 1.0, %v2024_v23  ;;  %v1316_v32 = vadd.f32 %v1315_v26, %v1184_v58  ;;  %v1317_v34 = vpop.f32.mrb[21].mxu0 }
 0x59d   : > { %v2028_v8 = vpop.eup %2027  ;;  %v1350_v0 = vadd.f32 1.0, %v2026_v29  ;;  %v1318_v25 = vadd.f32 %v1317_v34, %v1188_v63  ;;  %v1319_v30 = vpop.f32.mrb[22].mxu0  ;;  %v1356_v40 = vmul.f32 %v1348_v24, %v1324_v35 }
 0x59e   : > { %v1351_v2 = vadd.f32 1.0, %v2028_v8  ;;  %v1336_v27 = vmul.f32 0.70710677, %v1316_v32  ;;  %v1321_v33 = vpop.f32.mrb[23].mxu0  ;;  %v1320_v1 = vadd.f32 %v1319_v30, %v1184_v58  ;;  %v1357_v43 = vmul.f32 %v1349_v31, %v1325_v9 }
 0x59f   : > { %v1358_v41 = vmul.f32 %v1350_v0, %v1326_v36  ;;  %v1337_v13 = vmul.f32 0.70710677, %v1318_v25  ;;  %v1322_v45 = vadd.f32 %v1321_v33, %v1188_v63  ;;  %v1328_v55 = vmul.f32 0.5, %v1316_v32 }
 0x5a0   : > { %v1359_v44 = vmul.f32 %v1351_v2, %v1327_v38  ;;  %2029 = verf.f32 %v1336_v27  ;;  %v1338_v7 = vmul.f32 0.70710677, %v1320_v1  ;;  %v1330_v56 = vmul.f32 0.5, %v1320_v1 }
 0x5a1   : > { %v1364_v3 = vpack.c.bf16 %v1358_v41, %v1356_v40  ;;  %2031 = verf.f32 %v1337_v13  ;;  %v1339_v46 = vmul.f32 0.70710677, %v1322_v45  ;;  %v1329_v59 = vmul.f32 0.5, %v1318_v25 }
 0x5a2   : > { %v1365_v48 = vpack.c.bf16 %v1359_v44, %v1357_v43  ;;  %2033 = verf.f32 %v1338_v7  ;;  %v1331_v42 = vmul.f32 0.5, %v1322_v45 }
 0x5a3   : > { %2035 = verf.f32 %v1339_v46 }
 0x5a4   : > { %1528 = vmatprep.mubr.bf16.mxu1 %v1365_v48 }
 0x5a5   : > { %1529 = vmatmul.mubr.bf16.vlgmr.msra.gmra.mrb[16].mxu1 %v1364_v3 }
 0x5aa   : > { %v2030_v49 = vpop.eup %2029 }
 0x5ab   : > { %v2032_v50 = vpop.eup %2031  ;;  %v1352_v53 = vadd.f32 1.0, %v2030_v49 }
 0x5ac   : > { %v2034_v22 = vpop.eup %2033  ;;  %v1353_v54 = vadd.f32 1.0, %v2032_v50 }
 0x5ad   : > { %v2036_v52 = vpop.eup %2035  ;;  %v1354_v57 = vadd.f32 1.0, %v2034_v22  ;;  %v1360_v60 = vmul.f32 %v1352_v53, %v1328_v55 }
 0x5ae   : > { %v1355_v51 = vadd.f32 1.0, %v2036_v52  ;;  %v1361_v47 = vmul.f32 %v1353_v54, %v1329_v59 }
 0x5af   : > { %v1362_v61 = vmul.f32 %v1354_v57, %v1330_v56 }
 0x5b0   : > { %v1363_v62 = vmul.f32 %v1355_v51, %v1331_v42 }
 0x5b1   : > { %v1366_v58 = vpack.c.bf16 %v1362_v61, %v1360_v60 }
 0x5b2   : > { %v1367_v63 = vpack.c.bf16 %v1363_v62, %v1361_v47 }
 0x5b4   : > { %1536 = vmatprep.mubr.bf16.mxu1 %v1367_v63 }
 0x5b5   : > { %1537 = vmatmul.mubr.bf16.gmra.mrb[20].mxu1 %v1366_v58 }
 0x678   : > { %v1781_v4 = vpop.f32.mrb[16].mxu1 }
 0x679   : > { %v1782_v5 = vpop.f32.mrb[17].mxu1 }
 0x67a   : > { %v1783_v10 = vadd.f32 %v1782_v5, %v1781_v4  ;;  %v1784_v11 = vpop.f32.mrb[18].mxu1 }
 0x67b   : > { %v1785_v14 = vpop.f32.mrb[19].mxu1 }
 0x67c   : > { %v1545_v15 = vadd.f32 %v1783_v10, %v2610_v28  ;;  %v1786_v16 = vadd.f32 %v1785_v14, %v1784_v11 }
 0x67e   : > { %v1556_v18 = vadd.f32 %v1733_v12, %v1545_v15  ;;  %v1546_v19 = vadd.f32 %v1786_v16, %v2614_v6 }
 0x680   : > { %1560 = vst [vmem:[%s487_s10] sm:$0xff] %v1556_v18  ;;  %v1557_v20 = vadd.f32 %v1733_v12, %v1546_v19 }
 0x682   : > { %1561 = vst [vmem:[%s487_s10 + $0x8] sm:$0xff] %v1557_v20 }
 0x688   : > { %v1787_v17 = vpop.f32.mrb[20].mxu1 }
 0x689   : > { %v1788_v21 = vpop.f32.mrb[21].mxu1 }
 0x68a   : > { %v1789_v23 = vadd.f32 %v1788_v21, %v1787_v17  ;;  %v1790_v24 = vpop.f32.mrb[22].mxu1 }
 0x68b   : > { %v1791_v26 = vpop.f32.mrb[23].mxu1 }
 0x68c   : > { %v1547_v28 = vadd.f32 %v1789_v23, %v2618_v37  ;;  %v1792_v29 = vadd.f32 %v1791_v26, %v1790_v24 }
 0x68e   : > { %v1558_v6 = vadd.f32 %v1733_v12, %v1547_v28  ;;  %v1548_v31 = vadd.f32 %v1792_v29, %v2622_v39 }
 0x690   : > { %1562 = vst [vmem:[%s487_s10 + $0x10] sm:$0xff] %v1558_v6  ;;  %v1559_v32 = vadd.f32 %v1733_v12, %v1548_v31 }
 0x692   : > { %1563 = vst [vmem:[%s487_s10 + $0x18] sm:$0xff] %v1559_v32 }
 0x693   : > { %2136 = shalt.err (!%p2133_p1)
}
 0x694   : > { %s2137_s15 = scalar_lea.hbm %s2674_s25, 512  ;;  %s2141_s19 = scalar_lea.hbm %s2759_s16, 1024 }
 0x695   : > { %p2138_p13 = scmp.ne.s32.totalorder %s2674_s25, %s2137_s15  ;;  %p2142_p4 = scmp.lt.u32.totalorder %s2674_s25, %s2759_s16 }
 0x696   : > { %p2143_p7 = scmp.lt.u32.totalorder %s2141_s19, %s2137_s15  ;;  %p2145_p11 = scmp.lt.u32.totalorder %s2137_s15, %s2674_s25 }
 0x697   : > { %p2139_p6 = pnand %p2138_p13, %p2760_p0 }
 0x698   : > { %p2144_p8 = por %p2143_p7, %p2142_p4 }
 0x699   : > { %p2140_p10 = pneg %p2139_p6 }
 0x69a   : > { %p2146_p2 = por %p2145_p11, %p2144_p8 }
 0x69c   : > { %p2147_p3 = pnand %p2146_p2, %p2140_p10 }
 0x69e   : > { %2150 = shalt.err (!%p2147_p3)
}
 0x69f   : > { %s2206_s24 = smov 128   ;;  %s2207_s21 = smov 8  }
 0x6a0   : > { %1863 = dma.vmem_to_hbm [thread:$0]  (%p2760_p0), %s2668_s18, 512, %s2674_s25, %s1565_s13, %s2206_s24, %s2206_s24, %s2207_s21  }
 0x6a1 PF: > { %s2761_s12 = sld [smem:[#allocation13_spill]]  ;;  %s2762_s10 = sld [smem:[#allocation14_spill]] }
 0x6a2   : > { %p2764_p9 = scmp.ge.s32.totalorder %s2193_s28, 2 }
 0x6a7   : > { %s1593_s30 = sand.u32 1, %s2761_s12   ;;  %p2763_p5 = scmp.ne.s32.totalorder %s2762_s10, 0 }
 0x6a8   : > { %s1594_s15 = scalar_lea.sflag [#allocation5], %s1593_s30 }
 0x6a9   : > { %p1877_p12 = pnand %p2764_p9, %p2763_p5 }
 0x6ab   : > { %2176 = dma.done.wait (!%p1877_p12), %s1594_s15, 512  }
 0x6ac   : > { %2178 = vsyncadd (!%p1877_p12), %s1594_s15, 4294966784  ;;  %p27_p1 = scmp.ge.s32.totalorder %s2391_s23, 4   ;;  %s2765_s25 = smov %s2185_s26 }
 0x6ad   : > { %s2766_s26 = smov %s2189_s27  ;;  %s2767_s27 = smov %s2400_s17 }
 0x6ae   : > { %s2768_s28 = smov %s2391_s23  ;;  %29 = sbr.rel (!%p27_p1) target bundleno = 10 (0xa), region = 125 }
 0x6b5   :  { %1599 = vsyncpa [#allocation4], 1 }
 0x6b6   :  { %1601 = vsyncpa [#allocation4 + $0x1], 1 }
 0x6b7   :  { %1602 = vsyncpa [#allocation7], 1 }
 0x6b8   :  { %1603 = vsyncpa [#allocation5], 1 }
 0x6b9   :  { %1605 = vsyncpa [#allocation5 + $0x1], 1 }

</bundles_post_ra>
